<compile_context>
chip_gen: v6e
topology: v6e:2x2x1
jax: 0.10.0
libtpu: 0.0.40
codegen_flags: <defaults>
</compile_context>

<pallas_src>
import math

import jax
import jax.numpy as jnp
from jax.experimental import pallas as pl
from jax.experimental.pallas import tpu as pltpu

# ----- module hyper-parameters: MambaSSMLayer(d_model, d_state, d_conv, expand)
D_MODEL = 32
D_STATE = 8
D_CONV = 4
EXPAND = 2
D_INNER = EXPAND * D_MODEL            # 64
DT_RANK = math.ceil(D_MODEL / 16)     # 2  (Mamba default dt_rank="auto")
SD = D_STATE * D_INNER                # 512 = fused (state, inner) lane axis
CHUNK = 8                             # timesteps per scan chunk (1 sublane tile)
PAD = 8                               # sublane-aligned left zero pad for the conv


def _softplus(x):
    return jnp.maximum(x, 0.0) + jnp.log1p(jnp.exp(-jnp.abs(x)))


def _silu(x):
    return x * jax.nn.sigmoid(x)


# --------------------------------------------------------------------------- #
# Pallas kernel: one full Mamba forward pass for a single batch element.
# --------------------------------------------------------------------------- #
def mamba_kernel(x_ref, w_in_ref, w_conv_ref, b_conv_ref, w_ssm_ref,
                 b_dt_ref, a_flat_ref, w_xc_ref, d_ref, w_out_ref,
                 o_ref,
                 pad_scr, dA_scr, dBu_h_scr):
    L = x_ref.shape[1]
    x = x_ref[0]                                                   # (L, D_MODEL)

    # --- fused in_proj: single matmul with lane-dense N = 2*D_INNER = 128 ---
    xz = jnp.dot(x, w_in_ref[...], preferred_element_type=jnp.float32)   # (L, 128)
    x_in = xz[:, :D_INNER]                                         # SSM branch
    z = xz[:, D_INNER:]                                            # gate branch

    # --- causal depthwise conv1d via sublane-aligned zero-padded scratch ---
    pad_scr[pl.ds(0, PAD), :] = jnp.zeros((PAD, D_INNER), jnp.float32)
    pad_scr[pl.ds(PAD, L), :] = x_in                               # aligned store
    wc = w_conv_ref[...]                                           # (D_CONV, D_INNER)
    bc = b_conv_ref[...]                                           # (1, D_INNER)
    conv = bc + pad_scr[pl.ds(PAD - (D_CONV - 1), L), :] * wc[0:1, :]
    for k in range(1, D_CONV):
        conv = conv + pad_scr[pl.ds(PAD - (D_CONV - 1) + k, L), :] * wc[k:k + 1, :]
    u = _silu(conv)                                                # (L, D_INNER)

    # --- fused x_proj: [B expanded to (L, SD) | composed dt pre-activation]
    #     in ONE lane-dense (D_INNER, SD + D_INNER) matmul on the MXU ---
    ssm = jnp.dot(u, w_ssm_ref[...], preferred_element_type=jnp.float32)  # (L, 576)
    b_exp = ssm[:, :SD]                                            # (L, SD)  B[t,s] per block
    delta = _softplus(ssm[:, SD:SD + D_INNER] + b_dt_ref[...])     # (L, D_INNER)

    # --- discretization into lane-dense (L, SD) slabs ---
    # column s*D_INNER + d  <->  (state s, channel d)
    du = delta * u
    delta_t = jnp.concatenate([delta] * D_STATE, axis=1)           # (L, SD)
    du_t = jnp.concatenate([du] * D_STATE, axis=1)                 # (L, SD)
    dA_scr[...] = jnp.exp(delta_t * a_flat_ref[...])               # one EUP pass
    dBu_h_scr[...] = du_t * b_exp

    # --- selective scan: intra-chunk Hillis-Steele (3 levels over 8 sublanes),
    #     one combine with the carried h, one slab store per chunk.
    #     h history overwrites the dBu slab in place (read-then-store order). ---
    def chunk_body(c, h):
        base = pl.multiple_of(c * CHUNK, CHUNK)
        a = dA_scr[pl.ds(base, CHUNK), :]                          # (CHUNK, SD)
        b = dBu_h_scr[pl.ds(base, CHUNK), :]                       # (CHUNK, SD)
        # inclusive scan with (a_prev,b_prev)∘(a,b) = (a*a_prev, a*b_prev + b)
        for shift in (1, 2, 4):
            a_prev = jnp.concatenate(
                [jnp.ones((shift, SD), jnp.float32), a[:CHUNK - shift]], axis=0)
            b_prev = jnp.concatenate(
                [jnp.zeros((shift, SD), jnp.float32), b[:CHUNK - shift]], axis=0)
            b = a * b_prev + b                                     # uses pre-update a
            a = a * a_prev
        h_chunk = a * h + b                                        # (CHUNK, SD)
        dBu_h_scr[pl.ds(base, CHUNK), :] = h_chunk                 # h history
        return h_chunk[CHUNK - 1:CHUNK, :]                         # (1, SD) carry

    h0 = jnp.zeros((1, SD), jnp.float32)
    jax.lax.fori_loop(0, L // CHUNK, chunk_body, h0)

    # --- y = D*u + block-reduce_s(h_hist * C_exp)  (tree reduce over states) ---
    c_exp = jnp.dot(u, w_xc_ref[...], preferred_element_type=jnp.float32)  # (L, SD)
    r = dBu_h_scr[...] * c_exp                                     # (L, SD)
    width = SD
    while width > D_INNER:                                         # 512->256->128->64
        width //= 2
        r = r[:, :width] + r[:, width:]
    y = u * d_ref[...] + r

    # --- gating with silu(z), out_proj ---
    y = y * _silu(z)
    # TODO(synk): output store is 32/128 lane-masked (D_MODEL=32); lane-dense
    # repacking only pays off at larger d_model / L.
    o_ref[0] = jnp.dot(y, w_out_ref[...],
                       preferred_element_type=jnp.float32).astype(o_ref.dtype)


# --------------------------------------------------------------------------- #
# Wrapper
# --------------------------------------------------------------------------- #
def mamba_ssm_layer(x_nchw, p):
    B, C, H, W = x_nchw.shape
    assert C == D_MODEL
    L = H * W
    assert L % CHUNK == 0
    # (B, C, H, W) -> (B, L, C)   (matches x.view(B, C, H*W).transpose(1, 2))
    x_seq = jnp.transpose(x_nchw.reshape(B, C, L), (0, 2, 1)).astype(jnp.float32)

    # Fused / pre-expanded projection weights (built outside the kernel).
    w_in = jnp.concatenate([p["w_in_x"], p["w_in_z"]], axis=1)            # (D_MODEL, 128)
    w_delta = jnp.dot(p["w_x_dt"], p["w_dt"])                             # (D_INNER, D_INNER)
    w_xb_exp = jnp.repeat(p["w_x_b"], D_INNER, axis=1)                    # (D_INNER, SD)
    w_xc_exp = jnp.repeat(p["w_x_c"], D_INNER, axis=1)                    # (D_INNER, SD)
    w_ssm = jnp.concatenate([w_xb_exp, w_delta], axis=1)                  # (D_INNER, SD+D_INNER)
    a_flat = p["a_t"].reshape(1, SD)                                      # (1, SD)

    weights = [w_in, p["w_conv"], p["b_conv"], w_ssm, p["b_dt"],
               a_flat, w_xc_exp, p["d_skip"], p["w_out"]]
    # Constant-index weight BlockSpecs: the pipeline elides re-copies when the
    # block index is unchanged across grid steps, so weights are DMA'd once.
    weight_specs = [pl.BlockSpec(w.shape, lambda b: (0, 0)) for w in weights]

    # Advisory cost hint (kernel is latency-bound; helps XLA scheduling).
    flops = 2 * B * L * (D_MODEL * 2 * D_INNER
                         + D_INNER * (SD + D_INNER)
                         + D_INNER * SD
                         + D_INNER * D_MODEL) + 12 * B * L * SD
    transcendentals = B * L * (SD + 6 * D_INNER)
    bytes_accessed = 4 * (x_seq.size + B * L * D_MODEL
                          + sum(int(w.size) for w in weights))
    cost = pl.CostEstimate(flops=flops, transcendentals=transcendentals,
                           bytes_accessed=bytes_accessed)

    out = pl.pallas_call(
        mamba_kernel,
        out_shape=jax.ShapeDtypeStruct((B, L, D_MODEL), jnp.float32),
        grid_spec=pltpu.PrefetchScalarGridSpec(
            num_scalar_prefetch=0,
            grid=(B,),
            in_specs=[pl.BlockSpec((1, L, D_MODEL), lambda b: (b, 0, 0))] + weight_specs,
            out_specs=pl.BlockSpec((1, L, D_MODEL), lambda b: (b, 0, 0)),
            scratch_shapes=[
                pltpu.VMEM((PAD + L, D_INNER), jnp.float32),   # zero-padded conv input
                pltpu.VMEM((L, SD), jnp.float32),              # discretized A (lane-dense)
                pltpu.VMEM((L, SD), jnp.float32),              # dBu, overwritten by h history
            ]),
        compiler_params=pltpu.CompilerParams(
            dimension_semantics=("parallel",)),                # batch axis -> 2 TCs on v7x
        cost_estimate=cost,
    )(x_seq, *weights)
    return out   # (B, L, d_model)


# --------------------------------------------------------------------------- #
# Deterministic synthetic parameters (shapes as implied by Mamba's __init__,
# weights ~ trunc_normal(std=0.02)-like, biases zero, A from S4D-real, D = 1).
# --------------------------------------------------------------------------- #
def init_params(key):
    ks = jax.random.split(key, 8)
    std = 0.02
    p = {}
    p["w_in_x"] = std * jax.random.normal(ks[0], (D_MODEL, D_INNER), jnp.float32)
    p["w_in_z"] = std * jax.random.normal(ks[1], (D_MODEL, D_INNER), jnp.float32)
    p["w_conv"] = 0.2 * jax.random.normal(ks[2], (D_CONV, D_INNER), jnp.float32)
    p["b_conv"] = jnp.zeros((1, D_INNER), jnp.float32)
    p["w_x_dt"] = std * jax.random.normal(ks[3], (D_INNER, DT_RANK), jnp.float32)
    p["w_x_b"] = std * jax.random.normal(ks[4], (D_INNER, D_STATE), jnp.float32)
    p["w_x_c"] = std * jax.random.normal(ks[5], (D_INNER, D_STATE), jnp.float32)
    p["w_dt"] = std * jax.random.normal(ks[6], (DT_RANK, D_INNER), jnp.float32)
    p["b_dt"] = jnp.zeros((1, D_INNER), jnp.float32)
    # A_log = log(arange(1, d_state+1)) per channel  =>  A = -exp(A_log) = -[1..d_state]
    A = jnp.broadcast_to(jnp.arange(1, D_STATE + 1, dtype=jnp.float32), (D_INNER, D_STATE))
    p["a_t"] = (-A).T                                     # (D_STATE, D_INNER)
    p["d_skip"] = jnp.ones((1, D_INNER), jnp.float32)
    p["w_out"] = std * jax.random.normal(ks[7], (D_INNER, D_MODEL), jnp.float32)
    return p


# --------------------------------------------------------------------------- #
# Pure-JAX reference (same math as the PyTorch module) for a correctness check.
# --------------------------------------------------------------------------- #
def mamba_ref(x_nchw, p):
    B, C, H, W = x_nchw.shape
    L = H * W
    hp = jax.lax.Precision.HIGHEST
    x = jnp.transpose(x_nchw.reshape(B, C, L), (0, 2, 1)).astype(jnp.float32)
    x_in = jnp.dot(x, p["w_in_x"], precision=hp)
    z = jnp.dot(x, p["w_in_z"], precision=hp)
    xp = jnp.pad(x_in, ((0, 0), (D_CONV - 1, 0), (0, 0)))
    conv = sum(xp[:, k:k + L, :] * p["w_conv"][k] for k in range(D_CONV)) + p["b_conv"]
    u = _silu(conv)
    dt_low = jnp.dot(u, p["w_x_dt"], precision=hp)
    Bs = jnp.dot(u, p["w_x_b"], precision=hp)
    Cs = jnp.dot(u, p["w_x_c"], precision=hp)
    delta = _softplus(jnp.dot(dt_low, p["w_dt"], precision=hp) + p["b_dt"])
    A = p["a_t"].T                                                 # (D_INNER, D_STATE)
    dA = jnp.exp(delta[..., None] * A[None, None])                 # (B, L, D_INNER, D_STATE)
    dBu = delta[..., None] * u[..., None] * Bs[:, :, None, :]

    def step(h, inp):
        dA_t, dBu_t, C_t = inp
        h = dA_t * h + dBu_t
        y = jnp.sum(h * C_t[:, None, :], axis=-1)                  # (B, D_INNER)
        return h, y

    h0 = jnp.zeros((B, D_INNER, D_STATE), jnp.float32)
    _, ys = jax.lax.scan(step, h0, (jnp.swapaxes(dA, 0, 1),
                                    jnp.swapaxes(dBu, 0, 1),
                                    jnp.swapaxes(Cs, 0, 1)))
    y = jnp.swapaxes(ys, 0, 1)
    y = y + u * p["d_skip"]
    y = y * _silu(z)
    return jnp.dot(y, p["w_out"], precision=hp)


if __name__ == "__main__":
    key = jax.random.PRNGKey(0)
    pkey, xkey = jax.random.split(key)
    params = init_params(pkey)
    # small NCHW input consistent with the module: B=2, C=d_model=32, H=W=8
    x = jax.random.normal(xkey, (2, D_MODEL, 8, 8), jnp.float32)

    out = jax.jit(mamba_ssm_layer)(x, params)
    out = jax.block_until_ready(out)

    ref = mamba_ref(x, params)
    assert out.shape == (2, 8 * 8, D_MODEL), out.shape
    max_err = float(jnp.max(jnp.abs(out - ref)))
    if not bool(jnp.allclose(out, ref, rtol=5e-3, atol=5e-4)):
        raise AssertionError(f"kernel mismatch vs reference, max abs err = {max_err}")
    print("KERNEL_OK")
</pallas_src>

<mosaic_0001>
module attributes {stable_mosaic.version = 11 : i64} {
  func.func @mamba_kernel(%arg0: i32, %arg1: memref<1x64x32xf32, #tpu.memory_space<vmem>>, %arg2: memref<32x128xf32, #tpu.memory_space<vmem>>, %arg3: memref<4x64xf32, #tpu.memory_space<vmem>>, %arg4: memref<1x64xf32, #tpu.memory_space<vmem>>, %arg5: memref<64x576xf32, #tpu.memory_space<vmem>>, %arg6: memref<1x64xf32, #tpu.memory_space<vmem>>, %arg7: memref<1x512xf32, #tpu.memory_space<vmem>>, %arg8: memref<64x512xf32, #tpu.memory_space<vmem>>, %arg9: memref<1x64xf32, #tpu.memory_space<vmem>>, %arg10: memref<64x32xf32, #tpu.memory_space<vmem>>, %arg11: memref<1x64x32xf32, #tpu.memory_space<vmem>>, %arg12: memref<72x64xf32, #tpu.memory_space<vmem>>, %arg13: memref<64x512xf32, #tpu.memory_space<vmem>>, %arg14: memref<64x512xf32, #tpu.memory_space<vmem>>) attributes {dimension_semantics = [#tpu.dimension_semantics<parallel>], iteration_bounds = array<i64: 2>, scalar_prefetch = 0 : i64, scratch_operands = 3 : i64, tpu.core_type = #tpu.core_type<tc>, window_params = [{transform_indices = @transform_0, window_bounds = array<i64: 1, 64, 32>}, {pipeline_mode = #tpu.pipeline_mode<synchronous>, transform_indices = @transform_1, window_bounds = array<i64: 32, 128>}, {pipeline_mode = #tpu.pipeline_mode<synchronous>, transform_indices = @transform_2, window_bounds = array<i64: 4, 64>}, {pipeline_mode = #tpu.pipeline_mode<synchronous>, transform_indices = @transform_3, window_bounds = array<i64: 1, 64>}, {pipeline_mode = #tpu.pipeline_mode<synchronous>, transform_indices = @transform_4, window_bounds = array<i64: 64, 576>}, {pipeline_mode = #tpu.pipeline_mode<synchronous>, transform_indices = @transform_5, window_bounds = array<i64: 1, 64>}, {pipeline_mode = #tpu.pipeline_mode<synchronous>, transform_indices = @transform_6, window_bounds = array<i64: 1, 512>}, {pipeline_mode = #tpu.pipeline_mode<synchronous>, transform_indices = @transform_7, window_bounds = array<i64: 64, 512>}, {pipeline_mode = #tpu.pipeline_mode<synchronous>, transform_indices = @transform_8, window_bounds = array<i64: 1, 64>}, {pipeline_mode = #tpu.pipeline_mode<synchronous>, transform_indices = @transform_9, window_bounds = array<i64: 64, 32>}, {transform_indices = @transform_10, window_bounds = array<i64: 1, 64, 32>}]} {
    %c0 = arith.constant 0 : index
    %c0_0 = arith.constant 0 : index
    %c0_1 = arith.constant 0 : index
    %0 = vector.load %arg1[%c0, %c0_0, %c0_1] : memref<1x64x32xf32, #tpu.memory_space<vmem>>, vector<1x64x32xf32>
    %1 = vector.shape_cast %0 : vector<1x64x32xf32> to vector<64x32xf32>
    %c0_2 = arith.constant 0 : index
    %c0_3 = arith.constant 0 : index
    %2 = vector.load %arg2[%c0_2, %c0_3] : memref<32x128xf32, #tpu.memory_space<vmem>>, vector<32x128xf32>
    %cst = arith.constant dense<0.000000e+00> : vector<64x128xf32>
    %3 = tpu.matmul %1, %2, %cst {dimension_numbers = #tpu.dot_dimension_numbers<[1], [0], [0], [1], [0, 0, 1, 1], [], []>} : vector<64x32xf32>, vector<32x128xf32>, vector<64x128xf32> -> vector<64x128xf32>
    %4 = vector.extract_strided_slice %3 {offsets = [0, 0], sizes = [64, 64], strides = [1, 1]} : vector<64x128xf32> to vector<64x64xf32>
    %5 = vector.extract_strided_slice %3 {offsets = [0, 64], sizes = [64, 64], strides = [1, 1]} : vector<64x128xf32> to vector<64x64xf32>
    %cst_4 = arith.constant 0.000000e+00 : f32
    %6 = vector.broadcast %cst_4 : f32 to vector<8x64xf32>
    %c0_5 = arith.constant 0 : index
    %c0_6 = arith.constant 0 : index
    %7 = vector.load %arg12[%c0_5, %c0_6] : memref<72x64xf32, #tpu.memory_space<vmem>>, vector<8x64xf32>
    tpu.vector_store %arg12[%c0_5, %c0_6], %6 {strides = array<i32>} : memref<72x64xf32, #tpu.memory_space<vmem>>, vector<8x64xf32>,
    %c8 = arith.constant 8 : index
    %c0_7 = arith.constant 0 : index
    %8 = vector.load %arg12[%c8, %c0_7] : memref<72x64xf32, #tpu.memory_space<vmem>>, vector<64x64xf32>
    tpu.vector_store %arg12[%c8, %c0_7], %4 {strides = array<i32>} : memref<72x64xf32, #tpu.memory_space<vmem>>, vector<64x64xf32>,
    %c0_8 = arith.constant 0 : index
    %c0_9 = arith.constant 0 : index
    %9 = vector.load %arg3[%c0_8, %c0_9] : memref<4x64xf32, #tpu.memory_space<vmem>>, vector<4x64xf32>
    %c0_10 = arith.constant 0 : index
    %c0_11 = arith.constant 0 : index
    %10 = vector.load %arg4[%c0_10, %c0_11] : memref<1x64xf32, #tpu.memory_space<vmem>>, vector<1x64xf32>
    %c5 = arith.constant 5 : index
    %c0_12 = arith.constant 0 : index
    %11 = vector.load %arg12[%c5, %c0_12] : memref<72x64xf32, #tpu.memory_space<vmem>>, vector<64x64xf32>
    %12 = vector.extract_strided_slice %9 {offsets = [0, 0], sizes = [1, 64], strides = [1, 1]} : vector<4x64xf32> to vector<1x64xf32>
    %13 = vector.broadcast %12 : vector<1x64xf32> to vector<64x64xf32>
    %14 = arith.mulf %11, %13 : vector<64x64xf32>
    %15 = vector.broadcast %10 : vector<1x64xf32> to vector<64x64xf32>
    %16 = arith.addf %15, %14 : vector<64x64xf32>
    %c6 = arith.constant 6 : index
    %c0_13 = arith.constant 0 : index
    %17 = vector.load %arg12[%c6, %c0_13] : memref<72x64xf32, #tpu.memory_space<vmem>>, vector<64x64xf32>
    %18 = vector.extract_strided_slice %9 {offsets = [1, 0], sizes = [1, 64], strides = [1, 1]} : vector<4x64xf32> to vector<1x64xf32>
    %19 = vector.broadcast %18 : vector<1x64xf32> to vector<64x64xf32>
    %20 = arith.mulf %17, %19 : vector<64x64xf32>
    %21 = arith.addf %16, %20 : vector<64x64xf32>
    %c7 = arith.constant 7 : index
    %c0_14 = arith.constant 0 : index
    %22 = vector.load %arg12[%c7, %c0_14] : memref<72x64xf32, #tpu.memory_space<vmem>>, vector<64x64xf32>
    %23 = vector.extract_strided_slice %9 {offsets = [2, 0], sizes = [1, 64], strides = [1, 1]} : vector<4x64xf32> to vector<1x64xf32>
    %24 = vector.broadcast %23 : vector<1x64xf32> to vector<64x64xf32>
    %25 = arith.mulf %22, %24 : vector<64x64xf32>
    %26 = arith.addf %21, %25 : vector<64x64xf32>
    %c8_15 = arith.constant 8 : index
    %c0_16 = arith.constant 0 : index
    %27 = vector.load %arg12[%c8_15, %c0_16] : memref<72x64xf32, #tpu.memory_space<vmem>>, vector<64x64xf32>
    %28 = vector.extract_strided_slice %9 {offsets = [3, 0], sizes = [1, 64], strides = [1, 1]} : vector<4x64xf32> to vector<1x64xf32>
    %29 = vector.broadcast %28 : vector<1x64xf32> to vector<64x64xf32>
    %30 = arith.mulf %27, %29 : vector<64x64xf32>
    %31 = arith.addf %26, %30 : vector<64x64xf32>
    %32 = arith.negf %31 : vector<64x64xf32>
    %33 = math.exp %32 : vector<64x64xf32>
    %cst_17 = arith.constant 1.000000e+00 : f32
    %34 = vector.broadcast %cst_17 : f32 to vector<64x64xf32>
    %35 = arith.addf %34, %33 : vector<64x64xf32>
    %36 = arith.divf %34, %35 : vector<64x64xf32>
    %37 = arith.mulf %31, %36 : vector<64x64xf32>
    %c0_18 = arith.constant 0 : index
    %c0_19 = arith.constant 0 : index
    %38 = vector.load %arg5[%c0_18, %c0_19] : memref<64x576xf32, #tpu.memory_space<vmem>>, vector<64x576xf32>
    %cst_20 = arith.constant dense<0.000000e+00> : vector<64x576xf32>
    %39 = tpu.matmul %37, %38, %cst_20 {dimension_numbers = #tpu.dot_dimension_numbers<[1], [0], [0], [1], [0, 0, 1, 1], [], []>} : vector<64x64xf32>, vector<64x576xf32>, vector<64x576xf32> -> vector<64x576xf32>
    %40 = vector.extract_strided_slice %39 {offsets = [0, 0], sizes = [64, 512], strides = [1, 1]} : vector<64x576xf32> to vector<64x512xf32>
    %41 = vector.extract_strided_slice %39 {offsets = [0, 512], sizes = [64, 64], strides = [1, 1]} : vector<64x576xf32> to vector<64x64xf32>
    %c0_21 = arith.constant 0 : index
    %c0_22 = arith.constant 0 : index
    %42 = vector.load %arg6[%c0_21, %c0_22] : memref<1x64xf32, #tpu.memory_space<vmem>>, vector<1x64xf32>
    %43 = vector.broadcast %42 : vector<1x64xf32> to vector<64x64xf32>
    %44 = arith.addf %41, %43 : vector<64x64xf32>
    %cst_23 = arith.constant 0.000000e+00 : f32
    %45 = vector.broadcast %cst_23 : f32 to vector<64x64xf32>
    %46 = arith.maximumf %44, %45 : vector<64x64xf32>
    %47 = math.absf %44 : vector<64x64xf32>
    %cst_24 = arith.constant 0.000000e+00 : f32
    %48 = vector.broadcast %cst_24 : f32 to vector<64x64xf32>
    %49 = arith.subf %48, %47 : vector<64x64xf32>
    %50 = math.exp %49 : vector<64x64xf32>
    %51 = math.log1p %50 : vector<64x64xf32>
    %52 = arith.addf %46, %51 : vector<64x64xf32>
    %53 = arith.mulf %52, %37 : vector<64x64xf32>
    %54 = tpu.concatenate %52, %52, %52, %52, %52, %52, %52, %52 in 1 : vector<64x64xf32>, vector<64x64xf32>, vector<64x64xf32>, vector<64x64xf32>, vector<64x64xf32>, vector<64x64xf32>, vector<64x64xf32>, vector<64x64xf32> -> vector<64x512xf32>
    %55 = tpu.concatenate %53, %53, %53, %53, %53, %53, %53, %53 in 1 : vector<64x64xf32>, vector<64x64xf32>, vector<64x64xf32>, vector<64x64xf32>, vector<64x64xf32>, vector<64x64xf32>, vector<64x64xf32>, vector<64x64xf32> -> vector<64x512xf32>
    %c0_25 = arith.constant 0 : index
    %c0_26 = arith.constant 0 : index
    %56 = vector.load %arg7[%c0_25, %c0_26] : memref<1x512xf32, #tpu.memory_space<vmem>>, vector<1x512xf32>
    %57 = vector.broadcast %56 : vector<1x512xf32> to vector<64x512xf32>
    %58 = arith.mulf %54, %57 : vector<64x512xf32>
    %59 = math.exp %58 : vector<64x512xf32>
    %c0_27 = arith.constant 0 : index
    %c0_28 = arith.constant 0 : index
    %60 = vector.load %arg13[%c0_27, %c0_28] : memref<64x512xf32, #tpu.memory_space<vmem>>, vector<64x512xf32>
    tpu.vector_store %arg13[%c0_27, %c0_28], %59 {strides = array<i32>} : memref<64x512xf32, #tpu.memory_space<vmem>>, vector<64x512xf32>,
    %61 = arith.mulf %55, %40 : vector<64x512xf32>
    %c0_29 = arith.constant 0 : index
    %c0_30 = arith.constant 0 : index
    %62 = vector.load %arg14[%c0_29, %c0_30] : memref<64x512xf32, #tpu.memory_space<vmem>>, vector<64x512xf32>
    tpu.vector_store %arg14[%c0_29, %c0_30], %61 {strides = array<i32>} : memref<64x512xf32, #tpu.memory_space<vmem>>, vector<64x512xf32>,
    %cst_31 = arith.constant 0.000000e+00 : f32
    %63 = vector.broadcast %cst_31 : f32 to vector<1x512xf32>
    %c0_i32 = arith.constant 0 : i32
    %c8_i32 = arith.constant 8 : i32
    %64 = arith.addi %c0_i32, %c8_i32 : i32
    %c1_i32 = arith.constant 1 : i32
    %65 = scf.for %arg15 = %c0_i32 to %64 step %c1_i32 iter_args(%arg16 = %63) -> (vector<1x512xf32>)  : i32 {
      %c8_i32_47 = arith.constant 8 : i32
      %95 = arith.muli %arg15, %c8_i32_47 : i32
      %96 = tpu.assume_multiple %95, 8 : i32
      %97 = arith.index_cast %96 : i32 to index
      %c0_48 = arith.constant 0 : index
      %98 = vector.load %arg13[%97, %c0_48] : memref<64x512xf32, #tpu.memory_space<vmem>>, vector<8x512xf32>
      %99 = arith.index_cast %96 : i32 to index
      %c0_49 = arith.constant 0 : index
      %100 = vector.load %arg14[%99, %c0_49] : memref<64x512xf32, #tpu.memory_space<vmem>>, vector<8x512xf32>
      %cst_50 = arith.constant 1.000000e+00 : f32
      %101 = vector.broadcast %cst_50 : f32 to vector<1x512xf32>
      %102 = vector.extract_strided_slice %98 {offsets = [0, 0], sizes = [7, 512], strides = [1, 1]} : vector<8x512xf32> to vector<7x512xf32>
      %103 = tpu.concatenate %101, %102 in 0 : vector<1x512xf32>, vector<7x512xf32> -> vector<8x512xf32>
      %cst_51 = arith.constant 0.000000e+00 : f32
      %104 = vector.broadcast %cst_51 : f32 to vector<1x512xf32>
      %105 = vector.extract_strided_slice %100 {offsets = [0, 0], sizes = [7, 512], strides = [1, 1]} : vector<8x512xf32> to vector<7x512xf32>
      %106 = tpu.concatenate %104, %105 in 0 : vector<1x512xf32>, vector<7x512xf32> -> vector<8x512xf32>
      %107 = arith.mulf %98, %106 : vector<8x512xf32>
      %108 = arith.addf %107, %100 : vector<8x512xf32>
      %109 = arith.mulf %98, %103 : vector<8x512xf32>
      %cst_52 = arith.constant 1.000000e+00 : f32
      %110 = vector.broadcast %cst_52 : f32 to vector<2x512xf32>
      %111 = vector.extract_strided_slice %109 {offsets = [0, 0], sizes = [6, 512], strides = [1, 1]} : vector<8x512xf32> to vector<6x512xf32>
      %112 = tpu.concatenate %110, %111 in 0 : vector<2x512xf32>, vector<6x512xf32> -> vector<8x512xf32>
      %cst_53 = arith.constant 0.000000e+00 : f32
      %113 = vector.broadcast %cst_53 : f32 to vector<2x512xf32>
      %114 = vector.extract_strided_slice %108 {offsets = [0, 0], sizes = [6, 512], strides = [1, 1]} : vector<8x512xf32> to vector<6x512xf32>
      %115 = tpu.concatenate %113, %114 in 0 : vector<2x512xf32>, vector<6x512xf32> -> vector<8x512xf32>
      %116 = arith.mulf %109, %115 : vector<8x512xf32>
      %117 = arith.addf %116, %108 : vector<8x512xf32>
      %118 = arith.mulf %109, %112 : vector<8x512xf32>
      %cst_54 = arith.constant 1.000000e+00 : f32
      %119 = vector.broadcast %cst_54 : f32 to vector<4x512xf32>
      %120 = vector.extract_strided_slice %118 {offsets = [0, 0], sizes = [4, 512], strides = [1, 1]} : vector<8x512xf32> to vector<4x512xf32>
      %121 = tpu.concatenate %119, %120 in 0 : vector<4x512xf32>, vector<4x512xf32> -> vector<8x512xf32>
      %cst_55 = arith.constant 0.000000e+00 : f32
      %122 = vector.broadcast %cst_55 : f32 to vector<4x512xf32>
      %123 = vector.extract_strided_slice %117 {offsets = [0, 0], sizes = [4, 512], strides = [1, 1]} : vector<8x512xf32> to vector<4x512xf32>
      %124 = tpu.concatenate %122, %123 in 0 : vector<4x512xf32>, vector<4x512xf32> -> vector<8x512xf32>
      %125 = arith.mulf %118, %124 : vector<8x512xf32>
      %126 = arith.addf %125, %117 : vector<8x512xf32>
      %127 = arith.mulf %118, %121 : vector<8x512xf32>
      %128 = vector.broadcast %arg16 : vector<1x512xf32> to vector<8x512xf32>
      %129 = arith.mulf %127, %128 : vector<8x512xf32>
      %130 = arith.addf %129, %126 : vector<8x512xf32>
      %131 = arith.index_cast %96 : i32 to index
      %c0_56 = arith.constant 0 : index
      %132 = vector.load %arg14[%131, %c0_56] : memref<64x512xf32, #tpu.memory_space<vmem>>, vector<8x512xf32>
      tpu.vector_store %arg14[%131, %c0_56], %130 {strides = array<i32>} : memref<64x512xf32, #tpu.memory_space<vmem>>, vector<8x512xf32>,
      %133 = vector.extract_strided_slice %130 {offsets = [7, 0], sizes = [1, 512], strides = [1, 1]} : vector<8x512xf32> to vector<1x512xf32>
      scf.yield %133 : vector<1x512xf32>
    }
    %c8_i32_32 = arith.constant 8 : i32
    %c0_33 = arith.constant 0 : index
    %c0_34 = arith.constant 0 : index
    %66 = vector.load %arg8[%c0_33, %c0_34] : memref<64x512xf32, #tpu.memory_space<vmem>>, vector<64x512xf32>
    %cst_35 = arith.constant dense<0.000000e+00> : vector<64x512xf32>
    %67 = tpu.matmul %37, %66, %cst_35 {dimension_numbers = #tpu.dot_dimension_numbers<[1], [0], [0], [1], [0, 0, 1, 1], [], []>} : vector<64x64xf32>, vector<64x512xf32>, vector<64x512xf32> -> vector<64x512xf32>
    %c0_36 = arith.constant 0 : index
    %c0_37 = arith.constant 0 : index
    %68 = vector.load %arg14[%c0_36, %c0_37] : memref<64x512xf32, #tpu.memory_space<vmem>>, vector<64x512xf32>
    %69 = arith.mulf %68, %67 : vector<64x512xf32>
    %70 = vector.extract_strided_slice %69 {offsets = [0, 0], sizes = [64, 256], strides = [1, 1]} : vector<64x512xf32> to vector<64x256xf32>
    %71 = vector.extract_strided_slice %69 {offsets = [0, 256], sizes = [64, 256], strides = [1, 1]} : vector<64x512xf32> to vector<64x256xf32>
    %72 = arith.addf %70, %71 : vector<64x256xf32>
    %73 = vector.extract_strided_slice %72 {offsets = [0, 0], sizes = [64, 128], strides = [1, 1]} : vector<64x256xf32> to vector<64x128xf32>
    %74 = vector.extract_strided_slice %72 {offsets = [0, 128], sizes = [64, 128], strides = [1, 1]} : vector<64x256xf32> to vector<64x128xf32>
    %75 = arith.addf %73, %74 : vector<64x128xf32>
    %76 = vector.extract_strided_slice %75 {offsets = [0, 0], sizes = [64, 64], strides = [1, 1]} : vector<64x128xf32> to vector<64x64xf32>
    %77 = vector.extract_strided_slice %75 {offsets = [0, 64], sizes = [64, 64], strides = [1, 1]} : vector<64x128xf32> to vector<64x64xf32>
    %78 = arith.addf %76, %77 : vector<64x64xf32>
    %c0_38 = arith.constant 0 : index
    %c0_39 = arith.constant 0 : index
    %79 = vector.load %arg9[%c0_38, %c0_39] : memref<1x64xf32, #tpu.memory_space<vmem>>, vector<1x64xf32>
    %80 = vector.broadcast %79 : vector<1x64xf32> to vector<64x64xf32>
    %81 = arith.mulf %37, %80 : vector<64x64xf32>
    %82 = arith.addf %81, %78 : vector<64x64xf32>
    %83 = arith.negf %5 : vector<64x64xf32>
    %84 = math.exp %83 : vector<64x64xf32>
    %cst_40 = arith.constant 1.000000e+00 : f32
    %85 = vector.broadcast %cst_40 : f32 to vector<64x64xf32>
    %86 = arith.addf %85, %84 : vector<64x64xf32>
    %87 = arith.divf %85, %86 : vector<64x64xf32>
    %88 = arith.mulf %5, %87 : vector<64x64xf32>
    %89 = arith.mulf %82, %88 : vector<64x64xf32>
    %c0_41 = arith.constant 0 : index
    %c0_42 = arith.constant 0 : index
    %90 = vector.load %arg10[%c0_41, %c0_42] : memref<64x32xf32, #tpu.memory_space<vmem>>, vector<64x32xf32>
    %cst_43 = arith.constant dense<0.000000e+00> : vector<64x32xf32>
    %91 = tpu.matmul %89, %90, %cst_43 {dimension_numbers = #tpu.dot_dimension_numbers<[1], [0], [0], [1], [0, 0, 1, 1], [], []>} : vector<64x64xf32>, vector<64x32xf32>, vector<64x32xf32> -> vector<64x32xf32>
    %c0_44 = arith.constant 0 : index
    %c0_45 = arith.constant 0 : index
    %c0_46 = arith.constant 0 : index
    %92 = vector.load %arg11[%c0_44, %c0_45, %c0_46] : memref<1x64x32xf32, #tpu.memory_space<vmem>>, vector<1x64x32xf32>
    %93 = vector.shape_cast %92 : vector<1x64x32xf32> to vector<64x32xf32>
    %94 = vector.shape_cast %91 : vector<64x32xf32> to vector<1x64x32xf32>
    tpu.vector_store %arg11[%c0_44, %c0_45, %c0_46], %94 {strides = array<i32>} : memref<1x64x32xf32, #tpu.memory_space<vmem>>, vector<1x64x32xf32>,
    return
  }
  func.func @transform_0(%arg0: i32) -> (i32, i32, i32) {
    %c0_i32 = arith.constant 0 : i32
    %c0_i32_0 = arith.constant 0 : i32
    %c0_i32_1 = arith.constant 0 : i32
    return %arg0, %c0_i32, %c0_i32_0 : i32, i32, i32
  }
  func.func @transform_1(%arg0: i32) -> (i32, i32) {
    %c0_i32 = arith.constant 0 : i32
    %c0_i32_0 = arith.constant 0 : i32
    %c0_i32_1 = arith.constant 0 : i32
    return %c0_i32, %c0_i32_0 : i32, i32
  }
  func.func @transform_2(%arg0: i32) -> (i32, i32) {
    %c0_i32 = arith.constant 0 : i32
    %c0_i32_0 = arith.constant 0 : i32
    %c0_i32_1 = arith.constant 0 : i32
    return %c0_i32, %c0_i32_0 : i32, i32
  }
  func.func @transform_3(%arg0: i32) -> (i32, i32) {
    %c0_i32 = arith.constant 0 : i32
    %c0_i32_0 = arith.constant 0 : i32
    %c0_i32_1 = arith.constant 0 : i32
    return %c0_i32, %c0_i32_0 : i32, i32
  }
  func.func @transform_4(%arg0: i32) -> (i32, i32) {
    %c0_i32 = arith.constant 0 : i32
    %c0_i32_0 = arith.constant 0 : i32
    %c0_i32_1 = arith.constant 0 : i32
    return %c0_i32, %c0_i32_0 : i32, i32
  }
  func.func @transform_5(%arg0: i32) -> (i32, i32) {
    %c0_i32 = arith.constant 0 : i32
    %c0_i32_0 = arith.constant 0 : i32
    %c0_i32_1 = arith.constant 0 : i32
    return %c0_i32, %c0_i32_0 : i32, i32
  }
  func.func @transform_6(%arg0: i32) -> (i32, i32) {
    %c0_i32 = arith.constant 0 : i32
    %c0_i32_0 = arith.constant 0 : i32
    %c0_i32_1 = arith.constant 0 : i32
    return %c0_i32, %c0_i32_0 : i32, i32
  }
  func.func @transform_7(%arg0: i32) -> (i32, i32) {
    %c0_i32 = arith.constant 0 : i32
    %c0_i32_0 = arith.constant 0 : i32
    %c0_i32_1 = arith.constant 0 : i32
    return %c0_i32, %c0_i32_0 : i32, i32
  }
  func.func @transform_8(%arg0: i32) -> (i32, i32) {
    %c0_i32 = arith.constant 0 : i32
    %c0_i32_0 = arith.constant 0 : i32
    %c0_i32_1 = arith.constant 0 : i32
    return %c0_i32, %c0_i32_0 : i32, i32
  }
  func.func @transform_9(%arg0: i32) -> (i32, i32) {
    %c0_i32 = arith.constant 0 : i32
    %c0_i32_0 = arith.constant 0 : i32
    %c0_i32_1 = arith.constant 0 : i32
    return %c0_i32, %c0_i32_0 : i32, i32
  }
  func.func @transform_10(%arg0: i32) -> (i32, i32, i32) {
    %c0_i32 = arith.constant 0 : i32
    %c0_i32_0 = arith.constant 0 : i32
    %c0_i32_1 = arith.constant 0 : i32
    return %arg0, %c0_i32, %c0_i32_0 : i32, i32, i32
  }
}

</mosaic_0001>

<bundles_post_ra>
// kernel: mamba_ssm_layer.1
= control target key start
LH: loop header
LB: loop body
LE: loop exit
PB: predicated region body
PF: predicated region fallthrough
CT: control target
= control target key end

     0   :  { %s2980_s13 = smov 0   ;;  %s4051_s0 = inlined_call_operand.vmem [shape: f32[2,64,32], index: 0, kind: input, shape index: {}]   ;;  %s4052_s1 = inlined_call_operand.vmem [shape: f32[32,128], index: 1, kind: input, shape index: {}]   ;;  %s4053_s2 = inlined_call_operand.vmem [shape: f32[4,64], index: 2, kind: input, shape index: {}]   ;;  %s4054_s3 = inlined_call_operand.vmem [shape: f32[1,64], index: 3, kind: input, shape index: {}]   ;;  %s4055_s4 = inlined_call_operand.vmem [shape: f32[64,576], index: 4, kind: input, shape index: {}]   ;;  %s4056_s5 = inlined_call_operand.vmem [shape: f32[1,64], index: 5, kind: input, shape index: {}]   ;;  %s4057_s6 = inlined_call_operand.vmem [shape: f32[1,512], index: 6, kind: input, shape index: {}]   ;;  %s4058_s7 = inlined_call_operand.vmem [shape: f32[64,512], index: 7, kind: input, shape index: {}]   ;;  %s4059_s8 = inlined_call_operand.vmem [shape: f32[1,64], index: 8, kind: input, shape index: {}]   ;;  %s4060_s9 = inlined_call_operand.vmem [shape: f32[64,32], index: 9, kind: input, shape index: {}]   ;;  %s4061_s10 = inlined_call_operand.vmem [shape: f32[2,64,32], index: 10, kind: output, shape index: {}]  }
   0x1 LB: > { %s2435_s14 = sadd.s32 4294967295, %s2901_s13   ;;  %p2439_p0 = scmp.ge.s32.totalorder %s2901_s13, 1  ;;  %s2901_s13 = sphi %s2980_s13, %s20_s13  }
   0x2   : > { %p312_p1 = scmp.lt.s32.totalorder %s2901_s13, 3 }
   0x4   : > { %p313_p2 = pnand %p2439_p0, %p312_p1 }
   0x6   : > { %316 = sbr.rel (%p313_p2) target bundleno = 1303 (0x517), region = 60 }
   0xb   : > { %v371_v0 = vld [vmem:[%s4052_s1 + $0x18] sm:$0xff]  ;;  %v370_v1 = vld [vmem:[%s4052_s1 + $0x10] sm:$0xff]  ;;  %p350_p3 = scmp.lt.s32.totalorder %s2435_s14, 1  ;;  %v369_v2 = vld [vmem:[%s4052_s1 + $0x8] sm:$0xff]  ;;  %vm372_vm0 = vcmask 261120   ;;  %vm502_vm1 = vcmask 523264   ;;  %v522_v46 = vlaneseq }
   0xc   : > { %2573 = vmatprep.subr.mxu0 %v371_v0  ;;  %v368_v3 = vld [vmem:[%s4052_s1] sm:$0xff]  ;;  %v4062_v12 = vmov 0.0   ;;  %v723_v14 = vld [vmem:[%s4055_s4 + $0x118] sm:$0xff]  ;;  %v726_v15 = vld [vmem:[%s4055_s4 + $0x130] sm:$0xff]  ;;  %s2924_s25 = smov 64   ;;  %s3706_s28 = smov 0  }
   0xd   : > { %2574 = vmatpush3.msra.mxu0 %v371_v0  ;;  %s4153_s14 = smov (!%p350_p3, %s2435_s14), 1  ;;  %816 = vmatprep.mubr.f32.mxu1 %v4062_v12  ;;  %503 = vst.msk [vmem:[#allocation2] sm:$0xff] %vm502_vm1, %v4062_v12  ;;  %v724_v13 = vld [vmem:[%s4055_s4 + $0x120] sm:$0xff]  ;;  %v719_v16 = vld [vmem:[%s4055_s4 + $0xf8] sm:$0xff]  ;;  %v725_v17 = vld [vmem:[%s4055_s4 + $0x128] sm:$0xff]  ;;  %v3126_v48 = vshrl.u32 %v522_v46, 7 }
   0xe   : > { %2575 = vmatprep.subr.mxu0 %v370_v1  ;;  %s2525_s23 = sshll.u32 %s4153_s14, 6  ;;  %768 = vmatprep.subr.mxu1 %v724_v13  ;;  %v718_v18 = vld [vmem:[%s4055_s4 + $0xf0] sm:$0xff]  ;;  %v721_v19 = vld [vmem:[%s4055_s4 + $0x108] sm:$0xff]  ;;  %v720_v21 = vld [vmem:[%s4055_s4 + $0x100] sm:$0xff] }
   0xf   : > { %2576 = vmatpush3.msra.mxu0 %v370_v1  ;;  %s354_s26 = scalar_lea.vmem %s4051_s0, %s2525_s23  ;;  %s3006_s29 = scalar_lea.vmem %s4061_s10, %s2525_s23  ;;  %769 = vmatpush1.msra.mxu1 %v723_v14  ;;  %v714_v20 = vld [vmem:[%s4055_s4 + $0xd0] sm:$0xff]  ;;  %v713_v22 = vld [vmem:[%s4055_s4 + $0xc8] sm:$0xff]  ;;  %v716_v23 = vld [vmem:[%s4055_s4 + $0xe0] sm:$0xff]  ;;  %4103 = vst [vmem:[#allocation6_spill] sm:$0xff] %v3126_v48  ;;  %v4067_v50 = vsub.s32 0, %v3126_v48  ;;  %v4066_v52 = vsub.s32 1, %v3126_v48 }
  0x10   : > { %2577 = vmatprep.subr.mxu0 %v369_v2  ;;  %v360_v4 = vld [vmem:[%s354_s26] sm:$0xff]  ;;  %v361_v5 = vld [vmem:[%s354_s26 + $0x8] sm:$0xff]  ;;  %v362_v6 = vld [vmem:[%s354_s26 + $0x10] sm:$0xff]  ;;  %770 = vmatprep.subr.mxu1 %v719_v16  ;;  %v4065_v55 = vsub.s32 2, %v3126_v48  ;;  %v4064_v56 = vsub.s32 3, %v3126_v48 }
  0x11   : > { %2578 = vmatpush3.msra.mxu0 %v369_v2  ;;  %2581 = vmatprep.mubr.msk.f32.mxu0 %vm372_vm0, %v360_v4  ;;  %v363_v7 = vld [vmem:[%s354_s26 + $0x18] sm:$0xff]  ;;  %v364_v8 = vld [vmem:[%s354_s26 + $0x20] sm:$0xff]  ;;  %v365_v9 = vld [vmem:[%s354_s26 + $0x28] sm:$0xff] }
  0x12   : > { %2579 = vmatprep.subr.mxu0 %v368_v3  ;;  %v366_v10 = vld [vmem:[%s354_s26 + $0x30] sm:$0xff]  ;;  %v367_v11 = vld [vmem:[%s354_s26 + $0x38] sm:$0xff]  ;;  %771 = vmatpush1.msra.mxu1 %v718_v18  ;;  %v709_v24 = vld [vmem:[%s4055_s4 + $0xa8] sm:$0xff] }
  0x13   : > { %2580 = vmatpush3.msra.mxu0 %v368_v3  ;;  %v715_v25 = vld [vmem:[%s4055_s4 + $0xd8] sm:$0xff]  ;;  %772 = vmatprep.subr.mxu1 %v714_v20  ;;  %v708_v27 = vld [vmem:[%s4055_s4 + $0xa0] sm:$0xff]  ;;  %v710_v28 = vld [vmem:[%s4055_s4 + $0xb0] sm:$0xff] }
  0x14   : > { %2582 = vmatmul.mubr.msk.f32.vlgmr.msra.gmra.mxu0 %vm372_vm0, %v361_v5  ;;  %881 = vmatprep.subr.mxu0 %v726_v15  ;;  %v711_v26 = vld [vmem:[%s4055_s4 + $0xb8] sm:$0xff]  ;;  %v704_v29 = vld [vmem:[%s4055_s4 + $0x80] sm:$0xff]  ;;  %v706_v30 = vld [vmem:[%s4055_s4 + $0x90] sm:$0xff] }
  0x15   : > { %2584 = vmatprep.mubr.msk.f32.mxu0 %vm372_vm0, %v362_v6  ;;  %882 = vmatpush1.msra.mxu0 %v725_v17  ;;  %v703_v31 = vld [vmem:[%s4055_s4 + $0x78] sm:$0xff]  ;;  %v705_v32 = vld [vmem:[%s4055_s4 + $0x88] sm:$0xff]  ;;  %v698_v35 = vld [vmem:[%s4055_s4 + $0x50] sm:$0xff] }
  0x16   : > { %883 = vmatprep.subr.mxu0 %v721_v19  ;;  %773 = vmatpush1.msra.mxu1 %v713_v22  ;;  %v699_v33 = vld [vmem:[%s4055_s4 + $0x58] sm:$0xff]  ;;  %v701_v34 = vld [vmem:[%s4055_s4 + $0x68] sm:$0xff]  ;;  %v700_v36 = vld [vmem:[%s4055_s4 + $0x60] sm:$0xff] }
  0x17   : > { %884 = vmatpush1.msra.mxu0 %v720_v21  ;;  %774 = vmatprep.subr.mxu1 %v709_v24  ;;  %v694_v37 = vld [vmem:[%s4055_s4 + $0x30] sm:$0xff]  ;;  %v696_v38 = vld [vmem:[%s4055_s4 + $0x40] sm:$0xff]  ;;  %v693_v39 = vld [vmem:[%s4055_s4 + $0x28] sm:$0xff] }
  0x18   : > { %2585 = vmatmul.mubr.msk.f32.gmra.mxu0 %vm372_vm0, %v363_v7  ;;  %885 = vmatprep.subr.mxu0 %v716_v23  ;;  %v695_v40 = vld [vmem:[%s4055_s4 + $0x38] sm:$0xff]  ;;  %v689_v41 = vld [vmem:[%s4055_s4 + $0x8] sm:$0xff]  ;;  %v688_v43 = vld [vmem:[%s4055_s4] sm:$0xff] }
  0x19   : > { %2587 = vmatprep.mubr.msk.f32.mxu0 %vm372_vm0, %v364_v8  ;;  %886 = vmatpush1.msra.mxu0 %v715_v25  ;;  %v691_v42 = vld [vmem:[%s4055_s4 + $0x18] sm:$0xff]  ;;  %v690_v44 = vld [vmem:[%s4055_s4 + $0x10] sm:$0xff]  ;;  %v512_v54 = vld [vmem:[%s4053_s2] sm:$0xf] }
  0x1a   : > { %887 = vmatprep.subr.mxu0 %v711_v26  ;;  %775 = vmatpush1.msra.mxu1 %v708_v27  ;;  %v3119_v45 = vld [vmem:[%s4055_s4 + $0x138] sm:$0xff]  ;;  %v3149_v57 = vrot.slane %v512_v54, %v4067_v50  ;;  %v3158_v59 = vld [vmem:[%s4054_s3] ss:$0 sm:$0xff]  ;;  %v3162_v60 = vrot.slane %v512_v54, %v4066_v52  ;;  %v3168_v0 = vrot.slane %v512_v54, %v4065_v55 }
  0x1b   : > { %888 = vmatpush1.msra.mxu0 %v710_v28  ;;  %776 = vmatprep.subr.mxu1 %v704_v29  ;;  %v3172_v1 = vrot.slane %v512_v54, %v4064_v56 }
  0x1c   : > { %2588 = vmatmul.mubr.msk.f32.gmra.mxu0 %vm372_vm0, %v365_v9  ;;  %889 = vmatprep.subr.mxu0 %v706_v30 }
  0x1d   : > { %2590 = vmatprep.mubr.msk.f32.mxu0 %vm372_vm0, %v366_v10  ;;  %777 = vmatpush1.msra.mxu1 %v703_v31 }
  0x1e   : > { %890 = vmatpush1.msra.mxu0 %v705_v32  ;;  %778 = vmatprep.subr.mxu1 %v699_v33 }
  0x1f   : > { %891 = vmatprep.subr.mxu0 %v701_v34  ;;  %779 = vmatpush1.msra.mxu1 %v698_v35 }
  0x20   : > { %2591 = vmatmul.mubr.msk.f32.gmra.mxu0 %vm372_vm0, %v367_v11  ;;  %780 = vmatprep.subr.mxu1 %v694_v37 }
  0x21   : > { %929 = vmatprep.mubr.f32.mxu0 %v4062_v12  ;;  %892 = vmatpush1.msra.mxu0 %v700_v36 }
  0x22   : > { %893 = vmatprep.subr.mxu0 %v696_v38  ;;  %781 = vmatpush1.msra.mxu1 %v693_v39 }
  0x23   : > { %894 = vmatpush1.msra.mxu0 %v695_v40  ;;  %782 = vmatprep.subr.mxu1 %v689_v41 }
  0x24   : > { %895 = vmatprep.subr.mxu0 %v691_v42  ;;  %783 = vmatpush1.msra.mxu1 %v688_v43 }
  0x25   : > { %896 = vmatpush1.msra.mxu0 %v690_v44  ;;  %2593 = vmatprep.subr.mxu1 %v3119_v45 }
  0xd4   : > { %v3122_v47 = vpop.f32.mrf.mxu0 }
  0xd5   : > { %4102 = vst [vmem:[#allocation5_spill] sm:$0xff] %v3122_v47  ;;  %505 = vst.msk [vmem:[#allocation2 + $0x10] sm:$0xff] %vm502_vm1, %v3122_v47 }
  0xd6   : > { %v3128_v49 = vpop.f32.mrf.mxu0 }
  0xd7   : > { %4104 = vst [vmem:[#allocation7_spill] sm:$0xff] %v3128_v49  ;;  %504 = vst.msk [vmem:[#allocation2 + $0x8] sm:$0xff] %vm502_vm1, %v3128_v49 }
  0xd8   : > { %v3133_v51 = vpop.f32.mrf.mxu0 }
  0xd9   : > { %4105 = vst [vmem:[#allocation8_spill] sm:$0xff] %v3133_v51  ;;  %507 = vst.msk [vmem:[#allocation2 + $0x20] sm:$0xff] %vm502_vm1, %v3133_v51 }
  0xda   : > { %v3138_v53 = vpop.f32.mrf.mxu0 }
  0xdb   : > { %4106 = vst [vmem:[#allocation9_spill] sm:$0xff] %v3138_v53  ;;  %506 = vst.msk [vmem:[#allocation2 + $0x18] sm:$0xff] %vm502_vm1, %v3138_v53 }
  0xdc   : > { %v3151_v58 = vpop.f32.mrf.mxu0  ;;  %v605_v2 = vld [vmem:[#allocation2 + $0x10] sm:$0xff] }
  0xdd   : > { %4107 = vst [vmem:[#allocation10_spill] sm:$0xff] %v3151_v58  ;;  %509 = vst.msk [vmem:[#allocation2 + $0x30] sm:$0xff] %vm502_vm1, %v3151_v58  ;;  %v617_v19 = vmul.f32 %v3172_v1, %v605_v2 }
  0xde   : > { %v3164_v61 = vpop.f32.mrf.mxu0  ;;  %v514_v62 = vld [vmem:[#allocation2 + $0x5] sm:$0xff]  ;;  %v515_v5 = vld [vmem:[#allocation2 + $0xd] sm:$0xff] }
  0xdf   : > { %4108 = vst [vmem:[#allocation11_spill] sm:$0xff] %v3164_v61  ;;  %v548_v63 = vld [vmem:[#allocation2 + $0x6] sm:$0xff]  ;;  %508 = vst.msk [vmem:[#allocation2 + $0x28] sm:$0xff] %vm502_vm1, %v3164_v61  ;;  %v526_v3 = vmul.f32 %v3149_v57, %v514_v62  ;;  %v549_v6 = vld [vmem:[#allocation2 + $0xe] sm:$0xff]  ;;  %v527_v9 = vmul.f32 %v3149_v57, %v515_v5 }
  0xe0   : > { %v576_v4 = vld [vmem:[#allocation2 + $0x7] sm:$0xff]  ;;  %v3177_v7 = vpop.f32.mrf.mxu0  ;;  %v577_v10 = vld [vmem:[#allocation2 + $0xf] sm:$0xff]  ;;  %v560_v13 = vmul.f32 %v3162_v60, %v548_v63  ;;  %v561_v18 = vmul.f32 %v3162_v60, %v549_v6 }
  0xe1   : > { %4109 = vst [vmem:[#allocation12_spill] sm:$0xff] %v3177_v7  ;;  %v604_v8 = vld [vmem:[#allocation2 + $0x8] sm:$0xff]  ;;  %511 = vst.msk [vmem:[#allocation2 + $0x40] sm:$0xff] %vm502_vm1, %v3177_v7  ;;  %v540_v11 = vadd.f32 %v3158_v59, %v526_v3  ;;  %v607_v14 = vld [vmem:[#allocation2 + $0x20] sm:$0xff]  ;;  %v588_v16 = vmul.f32 %v3168_v0, %v576_v4  ;;  %v541_v17 = vadd.f32 %v3158_v59, %v527_v9 }
  0xe2   : > { %v3184_v15 = vpop.f32.mrf.mxu0  ;;  %v516_v20 = vld [vmem:[#allocation2 + $0x15] sm:$0xff]  ;;  %v616_v24 = vmul.f32 %v3172_v1, %v604_v8  ;;  %v589_v25 = vmul.f32 %v3168_v0, %v577_v10  ;;  %v517_v28 = vld [vmem:[#allocation2 + $0x1d] sm:$0xff]  ;;  %v619_v34 = vmul.f32 %v3172_v1, %v607_v14 }
  0xe3   : > { %4110 = vst [vmem:[#allocation13_spill] sm:$0xff] %v3184_v15  ;;  %v550_v21 = vld [vmem:[#allocation2 + $0x16] sm:$0xff]  ;;  %510 = vst.msk [vmem:[#allocation2 + $0x38] sm:$0xff] %vm502_vm1, %v3184_v15  ;;  %v568_v23 = vadd.f32 %v560_v13, %v540_v11  ;;  %v528_v26 = vmul.f32 %v3149_v57, %v516_v20  ;;  %v551_v29 = vld [vmem:[#allocation2 + $0x1e] sm:$0xff]  ;;  %v569_v30 = vadd.f32 %v561_v18, %v541_v17 }
  0xe4   : > { %v578_v22 = vld [vmem:[#allocation2 + $0x17] sm:$0xff]  ;;  %v529_v31 = vmul.f32 %v3149_v57, %v517_v28  ;;  %v563_v32 = vmul.f32 %v3162_v60, %v551_v29  ;;  %v579_v33 = vld [vmem:[#allocation2 + $0x1f] sm:$0xff]  ;;  %v562_v37 = vmul.f32 %v3162_v60, %v550_v21 }
  0xe5   : > { %v606_v27 = vld [vmem:[#allocation2 + $0x18] sm:$0xff]  ;;  %v596_v35 = vadd.f32 %v588_v16, %v568_v23  ;;  %v542_v36 = vadd.f32 %v3158_v59, %v528_v26  ;;  %v590_v38 = vmul.f32 %v3168_v0, %v578_v22  ;;  %v597_v39 = vadd.f32 %v589_v25, %v569_v30  ;;  %v609_v22 = vld [vmem:[#allocation2 + $0x30] sm:$0xff] }
  0xe6   : > { %v618_v40 = vmul.f32 %v3172_v1, %v606_v27  ;;  %v543_v41 = vadd.f32 %v3158_v59, %v529_v31  ;;  %v591_v42 = vmul.f32 %v3168_v0, %v579_v33  ;;  %v518_v43 = vld [vmem:[#allocation2 + $0x25] sm:$0xff]  ;;  %v519_v4 = vld [vmem:[#allocation2 + $0x2d] sm:$0xff] }
  0xe7   : > { %v552_v44 = vld [vmem:[#allocation2 + $0x26] sm:$0xff]  ;;  %v3204_v54 = vadd.f32 %v616_v24, %v596_v35  ;;  %v570_v62 = vadd.f32 %v562_v37, %v542_v36  ;;  %v530_v63 = vmul.f32 %v3149_v57, %v518_v43  ;;  %v553_v5 = vld [vmem:[#allocation2 + $0x2e] sm:$0xff]  ;;  %v3208_v6 = vadd.f32 %v617_v19, %v597_v39 }
  0xe8   : > { %v580_v46 = vld [vmem:[#allocation2 + $0x27] sm:$0xff]  ;;  %v564_v2 = vmul.f32 %v3162_v60, %v552_v44  ;;  %v571_v8 = vadd.f32 %v563_v32, %v543_v41  ;;  %v581_v11 = vld [vmem:[#allocation2 + $0x2f] sm:$0xff]  ;;  %v531_v17 = vmul.f32 %v3149_v57, %v519_v4  ;;  %v565_v21 = vmul.f32 %v3162_v60, %v553_v5 }
  0xe9   : > { %v608_v3 = vld [vmem:[#allocation2 + $0x28] sm:$0xff]  ;;  %v592_v9 = vmul.f32 %v3168_v0, %v580_v46  ;;  %v2453_v13 = vmul.f32 -1.442695, %v3204_v54  ;;  %v598_v14 = vadd.f32 %v590_v38, %v570_v62  ;;  %v544_v16 = vadd.f32 %v3158_v59, %v530_v63 }
  0xea   : > { %v620_v10 = vmul.f32 %v3172_v1, %v608_v3  ;;  %v2454_v18 = vmul.f32 -1.442695, %v3208_v6  ;;  %v599_v20 = vadd.f32 %v591_v42, %v571_v8  ;;  %v593_v19 = vmul.f32 %v3168_v0, %v581_v11  ;;  %v520_v23 = vld [vmem:[#allocation2 + $0x35] sm:$0xff]  ;;  %v521_v29 = vld [vmem:[#allocation2 + $0x3d] sm:$0xff] }
  0xeb   : > { %v554_v24 = vld [vmem:[#allocation2 + $0x36] sm:$0xff]  ;;  %2715 = vpow2.f32 %v2453_v13  ;;  %v3218_v25 = vadd.f32 %v618_v40, %v598_v14  ;;  %v572_v26 = vadd.f32 %v564_v2, %v544_v16  ;;  %v545_v27 = vadd.f32 %v3158_v59, %v531_v17  ;;  %v555_v33 = vld [vmem:[#allocation2 + $0x3e] sm:$0xff] }
  0xec   : > { %v582_v28 = vld [vmem:[#allocation2 + $0x37] sm:$0xff]  ;;  %2717 = vpow2.f32 %v2454_v18  ;;  %v3221_v30 = vadd.f32 %v619_v34, %v599_v20  ;;  %v532_v31 = vmul.f32 %v3149_v57, %v520_v23  ;;  %v566_v32 = vmul.f32 %v3162_v60, %v554_v24  ;;  %v583_v40 = vld [vmem:[#allocation2 + $0x3f] sm:$0xff] }
  0xed   : > { %v2455_v35 = vmul.f32 -1.442695, %v3218_v25  ;;  %v600_v36 = vadd.f32 %v592_v9, %v572_v26  ;;  %v573_v37 = vadd.f32 %v565_v21, %v545_v27  ;;  %v621_v38 = vmul.f32 %v3172_v1, %v609_v22  ;;  %v610_v39 = vld [vmem:[#allocation2 + $0x38] sm:$0xff]  ;;  %v611_v9 = vld [vmem:[#allocation2 + $0x40] sm:$0xff] }
  0xee   : > { %v2456_v41 = vmul.f32 -1.442695, %v3221_v30  ;;  %v546_v42 = vadd.f32 %v3158_v59, %v532_v31  ;;  %v594_v34 = vmul.f32 %v3168_v0, %v582_v28  ;;  %v533_v43 = vmul.f32 %v3149_v57, %v521_v29 }
  0xef   : > { %2719 = vpow2.f32 %v2455_v35  ;;  %v3231_v44 = vadd.f32 %v620_v10, %v600_v36  ;;  %v601_v46 = vadd.f32 %v593_v19, %v573_v37  ;;  %v567_v62 = vmul.f32 %v3162_v60, %v555_v33  ;;  %v722_v35 = vld [vmem:[%s4055_s4 + $0x110] sm:$0xff] }
  0xf0   : > { %v574_v63 = vadd.f32 %v566_v32, %v546_v42  ;;  %v622_v2 = vmul.f32 %v3172_v1, %v610_v39  ;;  %v547_v3 = vadd.f32 %v3158_v59, %v533_v43  ;;  %v595_v4 = vmul.f32 %v3168_v0, %v583_v40  ;;  %v717_v39 = vld [vmem:[%s4055_s4 + $0xe8] sm:$0xff] }
  0xf1   : > { %2721 = vpow2.f32 %v2456_v41  ;;  %v2457_v5 = vmul.f32 -1.442695, %v3231_v44  ;;  %v3238_v8 = vadd.f32 %v621_v38, %v601_v46  ;;  %v623_v60 = vmul.f32 %v3172_v1, %v611_v9  ;;  %v712_v41 = vld [vmem:[%s4055_s4 + $0xc0] sm:$0xff]  ;;  %v702_v46 = vld [vmem:[%s4055_s4 + $0x70] sm:$0xff] }
  0xf2   : > { %v602_v57 = vadd.f32 %v594_v34, %v574_v63  ;;  %v575_v11 = vadd.f32 %v567_v62, %v547_v3  ;;  %v707_v34 = vld [vmem:[%s4055_s4 + $0x98] sm:$0xff]  ;;  %v697_v63 = vld [vmem:[%s4055_s4 + $0x48] sm:$0xff] }
  0xf3   : > { %2723 = vpow2.f32 %v2457_v5  ;;  %v2458_v14 = vmul.f32 -1.442695, %v3238_v8 }
  0xf4   : > { %v3240_v10 = vadd.f32 %v622_v2, %v602_v57  ;;  %v603_v13 = vadd.f32 %v595_v4, %v575_v11  ;;  %v692_v4 = vld [vmem:[%s4055_s4 + $0x20] sm:$0xff] }
  0xf5   : > { %2725 = vpow2.f32 %v2458_v14 }
  0xf6   : > { %v2459_v59 = vmul.f32 -1.442695, %v3240_v10  ;;  %v3245_v0 = vadd.f32 %v623_v60, %v603_v13 }
  0xf8   : > { %v2716_v16 = vpop.eup %2715  ;;  %v2460_v19 = vmul.f32 -1.442695, %v3245_v0 }
  0xf9   : > { %v2718_v17 = vpop.eup %2717  ;;  %v656_v18 = vadd.f32 1.0, %v2716_v16 }
  0xfa   : > { %v657_v20 = vadd.f32 1.0, %v2718_v17 }
  0xfb   : > { %2727 = vrcp.f32 %v656_v18 }
  0xfc   : > { %v2720_v21 = vpop.eup %2719  ;;  %2729 = vpow2.f32 %v2459_v59 }
  0xfd   : > { %2731 = vrcp.f32 %v657_v20  ;;  %v658_v22 = vadd.f32 1.0, %v2720_v21 }
  0xfe   : > { %v2722_v1 = vpop.eup %2721  ;;  %2733 = vpow2.f32 %v2460_v19 }
  0xff   : > { %2735 = vrcp.f32 %v658_v22  ;;  %v659_v23 = vadd.f32 1.0, %v2722_v1  ;;  %v2485_v22 = vld [vmem:[%s4056_s5] ss:$0 sm:$0xff] }
 0x100   : > { %v2724_v24 = vpop.eup %2723 }
 0x101   : > { %2737 = vrcp.f32 %v659_v23  ;;  %v660_v26 = vadd.f32 1.0, %v2724_v24 }
 0x102   : > { %v2726_v27 = vpop.eup %2725 }
 0x103   : > { %2739 = vrcp.f32 %v660_v26  ;;  %v661_v32 = vadd.f32 1.0, %v2726_v27 }
 0x105   : > { %2741 = vrcp.f32 %v661_v32 }
 0x108   : > { %v2728_v28 = vpop.eup %2727 }
 0x109   : > { %v2730_v29 = vpop.eup %2729  ;;  %v3249_v31 = vmul.f32 %v2728_v28, %v3204_v54 }
 0x10a   : > { %v2732_v33 = vpop.eup %2731  ;;  %v662_v37 = vadd.f32 1.0, %v2730_v29 }
 0x10b   : > { %4111 = vst [vmem:[#allocation14_spill] sm:$0xff] %v3249_v31  ;;  %2461 = vmatmul.mubr.msk.f32.vlgmr.msra.gmra.mxu1 %vm502_vm1, %v3249_v31  ;;  %2469 = vmatmul.mubr.msk.f32.vlgmr.msra.gmra.mxu0 %vm502_vm1, %v3249_v31  ;;  %v2734_v36 = vpop.eup %2733  ;;  %v3262_v54 = vmul.f32 %v2732_v33, %v3208_v6 }
 0x10c   : > { %2594 = vmatpush3.msra.mxu1 %v3119_v45  ;;  %822 = vmatprep.mubr.f32.mxu1 %v4062_v12  ;;  %v2736_v38 = vpop.eup %2735  ;;  %2743 = vrcp.f32 %v662_v37  ;;  %v663_v6 = vadd.f32 1.0, %v2734_v36 }
 0x10d   : > { %935 = vmatprep.mubr.f32.mxu0 %v4062_v12  ;;  %2595 = vmatprep.subr.mxu1 %v722_v35  ;;  %4112 = vst [vmem:[#allocation15_spill] sm:$0xff] %v3262_v54  ;;  %v3274_v45 = vmul.f32 %v2736_v38, %v3218_v25 }
 0x10e   : > { %2596 = vmatpush3.msra.mxu1 %v722_v35  ;;  %v2738_v40 = vpop.eup %2737  ;;  %2745 = vrcp.f32 %v663_v6 }
 0x10f   : > { %2462 = vmatmul.mubr.msk.f32.gmra.mxu1 %vm502_vm1, %v3262_v54  ;;  %2470 = vmatmul.mubr.msk.f32.gmra.mxu0 %vm502_vm1, %v3262_v54  ;;  %4113 = vst [vmem:[#allocation16_spill] sm:$0xff] %v3274_v45  ;;  %v3286_v25 = vmul.f32 %v2738_v40, %v3221_v30 }
 0x110   : > { %828 = vmatprep.mubr.f32.mxu1 %v4062_v12  ;;  %941 = vmatprep.mubr.f32.mxu0 %v4062_v12  ;;  %v2740_v42 = vpop.eup %2739 }
 0x111   : > { %2597 = vmatprep.subr.mxu1 %v717_v39  ;;  %4114 = vst [vmem:[#allocation17_spill] sm:$0xff] %v3286_v25  ;;  %v3298_v30 = vmul.f32 %v2740_v42, %v3231_v44 }
 0x112   : > { %2598 = vmatpush3.msra.mxu1 %v717_v39  ;;  %v2742_v43 = vpop.eup %2741 }
 0x113   : > { %2463 = vmatmul.mubr.msk.f32.gmra.mxu1 %vm502_vm1, %v3274_v45  ;;  %2471 = vmatmul.mubr.msk.f32.gmra.mxu0 %vm502_vm1, %v3274_v45  ;;  %4115 = vst [vmem:[#allocation18_spill] sm:$0xff] %v3298_v30  ;;  %v3310_v44 = vmul.f32 %v2742_v43, %v3238_v8 }
 0x114   : > { %834 = vmatprep.mubr.f32.mxu1 %v4062_v12  ;;  %947 = vmatprep.mubr.f32.mxu0 %v4062_v12 }
 0x115   : > { %2599 = vmatprep.subr.mxu1 %v712_v41  ;;  %4116 = vst [vmem:[#allocation19_spill] sm:$0xff] %v3310_v44 }
 0x116   : > { %2600 = vmatpush3.msra.mxu1 %v712_v41 }
 0x117   : > { %2464 = vmatmul.mubr.msk.f32.gmra.mxu1 %vm502_vm1, %v3286_v25  ;;  %2472 = vmatmul.mubr.msk.f32.gmra.mxu0 %vm502_vm1, %v3286_v25 }
 0x118   : > { %840 = vmatprep.mubr.f32.mxu1 %v4062_v12  ;;  %953 = vmatprep.mubr.f32.mxu0 %v4062_v12 }
 0x119   : > { %2601 = vmatprep.subr.mxu1 %v707_v34  ;;  %v2744_v62 = vpop.eup %2743 }
 0x11a   : > { %2602 = vmatpush3.msra.mxu1 %v707_v34  ;;  %v3322_v2 = vmul.f32 %v2744_v62, %v3240_v10 }
 0x11b   : > { %2465 = vmatmul.mubr.msk.f32.gmra.mxu1 %vm502_vm1, %v3298_v30  ;;  %2473 = vmatmul.mubr.msk.f32.gmra.mxu0 %vm502_vm1, %v3298_v30  ;;  %v2746_v3 = vpop.eup %2745 }
 0x11c   : > { %846 = vmatprep.mubr.f32.mxu1 %v4062_v12  ;;  %959 = vmatprep.mubr.f32.mxu0 %v4062_v12  ;;  %4117 = vst [vmem:[#allocation20_spill] sm:$0xff] %v3322_v2  ;;  %v3334_v5 = vmul.f32 %v2746_v3, %v3245_v0 }
 0x11d   : > { %2603 = vmatprep.subr.mxu1 %v702_v46 }
 0x11e   : > { %2604 = vmatpush3.msra.mxu1 %v702_v46  ;;  %4118 = vst [vmem:[#allocation21_spill] sm:$0xff] %v3334_v5 }
 0x11f   : > { %2466 = vmatmul.mubr.msk.f32.gmra.mxu1 %vm502_vm1, %v3310_v44  ;;  %2474 = vmatmul.mubr.msk.f32.gmra.mxu0 %vm502_vm1, %v3310_v44 }
 0x120   : > { %852 = vmatprep.mubr.f32.mxu1 %v4062_v12  ;;  %965 = vmatprep.mubr.f32.mxu0 %v4062_v12 }
 0x121   : > { %2605 = vmatprep.subr.mxu1 %v697_v63 }
 0x122   : > { %2606 = vmatpush3.msra.mxu1 %v697_v63 }
 0x123   : > { %2467 = vmatmul.mubr.msk.f32.gmra.mxu1 %vm502_vm1, %v3322_v2  ;;  %2475 = vmatmul.mubr.msk.f32.gmra.mxu0 %vm502_vm1, %v3322_v2 }
 0x124   : > { %858 = vmatprep.mubr.f32.mxu1 %v4062_v12  ;;  %971 = vmatprep.mubr.f32.mxu0 %v4062_v12 }
 0x125   : > { %2607 = vmatprep.subr.mxu1 %v692_v4 }
 0x126   : > { %2608 = vmatpush3.msra.mxu1 %v692_v4 }
 0x127   : > { %2468 = vmatmul.mubr.msk.f32.gmra.mxu1 %vm502_vm1, %v3334_v5  ;;  %2476 = vmatmul.mubr.msk.f32.gmra.mxu0 %vm502_vm1, %v3334_v5 }
 0x128   : > { %2609 = vmatprep.mubr.msk.f32.mxu1 %vm502_vm1, %v3249_v31 }
 0x12b   : > { %2610 = vmatmul.mubr.msk.f32.vlgmr.msra.gmra.mxu1 %vm502_vm1, %v3262_v54 }
 0x12c   : > { %2612 = vmatprep.mubr.msk.f32.mxu1 %vm502_vm1, %v3274_v45 }
 0x12f   : > { %2613 = vmatmul.mubr.msk.f32.gmra.mxu1 %vm502_vm1, %v3286_v25 }
 0x130   : > { %2615 = vmatprep.mubr.msk.f32.mxu1 %vm502_vm1, %v3298_v30 }
 0x133   : > { %2616 = vmatmul.mubr.msk.f32.gmra.mxu1 %vm502_vm1, %v3310_v44 }
 0x134   : > { %2618 = vmatprep.mubr.msk.f32.mxu1 %vm502_vm1, %v3322_v2 }
 0x137   : > { %2619 = vmatmul.mubr.msk.f32.gmra.mxu1 %vm502_vm1, %v3334_v5 }
 0x1cb   : > { %v3356_v8 = vpop.f32.mrf.mxu1 }
 0x1cd   : > { %v3358_v9 = vpop.f32.mrf.mxu1 }
 0x1cf   : > { %v3360_v57 = vpop.f32.mrf.mxu1 }
 0x1d1   : > { %v3362_v11 = vpop.f32.mrf.mxu1 }
 0x1d3   : > { %v3364_v10 = vpop.f32.mrf.mxu1 }
 0x1d5   : > { %v3366_v13 = vpop.f32.mrf.mxu1 }
 0x1d7   : > { %v3368_v60 = vpop.f32.mrf.mxu1 }
 0x1d9   : > { %v3370_v14 = vpop.f32.mrf.mxu1 }
 0x1db   : > { %v3372_v16 = vpop.f32.mrf.mxu1 }
 0x1dd   : > { %v3374_v59 = vpop.f32.mrf.mxu1 }
 0x1df   : > { %v3376_v0 = vpop.f32.mrf.mxu1 }
 0x1e1   : > { %v3378_v17 = vpop.f32.mrf.mxu1 }
 0x1e3   : > { %v3380_v18 = vpop.f32.mrf.mxu1 }
 0x1e5   : > { %v3382_v20 = vpop.f32.mrf.mxu1 }
 0x1e7   : > { %v3384_v21 = vpop.f32.mrf.mxu1 }
 0x1e8   : > { %4119 = vst [vmem:[#allocation22_spill] sm:$0xff] %v3384_v21 }
 0x1e9   : > { %v3386_v19 = vpop.f32.mrf.mxu1 }
 0x1ea   : > { %4120 = vst [vmem:[#allocation23_spill] sm:$0xff] %v3386_v19 }
 0x1eb   : > { %v2611_v1 = vpop.f32.mrf.mxu1 }
 0x1ec   : > { %v3391_v23 = vadd.f32 %v2611_v1, %v2485_v22 }
 0x1ed   : > { %v1044_v24 = vpop.f32.mrf.mxu1 }
 0x1ee   : > { %v1107_v26 = vand.u32 2147483647, %v3391_v23  ;;  %v3394_v27 = vadd.f32 %v2485_v22, %v1044_v24 }
 0x1ef   : > { %v2614_v28 = vpop.f32.mrf.mxu1 }
 0x1f0   : > { %v1115_v29 = vsub.f32 0.0, %v1107_v26  ;;  %v1106_v32 = vand.u32 2147483647, %v3394_v27  ;;  %v3397_v33 = vadd.f32 %v2614_v28, %v2485_v22 }
 0x1f1   : > { %v1054_v35 = vpop.f32.mrf.mxu1 }
 0x1f2   : > { %v1124_v36 = vmul.f32 1.442695, %v1115_v29  ;;  %v1114_v37 = vsub.f32 0.0, %v1106_v32  ;;  %v1109_v38 = vand.u32 2147483647, %v3397_v33  ;;  %v3400_v39 = vadd.f32 %v2485_v22, %v1054_v35 }
 0x1f3   : > { %v2617_v6 = vpop.f32.mrf.mxu1 }
 0x1f4   : > { %2747 = vpow2.f32 %v1124_v36  ;;  %v1122_v40 = vmul.f32 1.442695, %v1114_v37  ;;  %v1117_v41 = vsub.f32 0.0, %v1109_v38  ;;  %v3402_v42 = vadd.f32 %v2617_v6, %v2485_v22 }
 0x1f5   : > { %v1108_v34 = vand.u32 2147483647, %v3400_v39  ;;  %v1064_v43 = vpop.f32.mrf.mxu1 }
 0x1f6   : > { %2749 = vpow2.f32 %v1122_v40  ;;  %v1128_v46 = vmul.f32 1.442695, %v1117_v41  ;;  %v1111_v62 = vand.u32 2147483647, %v3402_v42  ;;  %v3406_v3 = vadd.f32 %v2485_v22, %v1064_v43 }
 0x1f7   : > { %v1116_v63 = vsub.f32 0.0, %v1108_v34  ;;  %v2620_v4 = vpop.f32.mrf.mxu1 }
 0x1f8   : > { %2751 = vpow2.f32 %v1128_v46  ;;  %v1119_v1 = vsub.f32 0.0, %v1111_v62  ;;  %v3408_v24 = vadd.f32 %v2620_v4, %v2485_v22  ;;  %v1110_v28 = vand.u32 2147483647, %v3406_v3 }
 0x1f9   : > { %v1126_v26 = vmul.f32 1.442695, %v1116_v63  ;;  %v1074_v29 = vpop.f32.mrf.mxu1 }
 0x1fa   : > { %v1132_v32 = vmul.f32 1.442695, %v1119_v1  ;;  %v1113_v35 = vand.u32 2147483647, %v3408_v24  ;;  %v3412_v36 = vadd.f32 %v2485_v22, %v1074_v29  ;;  %v1118_v37 = vsub.f32 0.0, %v1110_v28 }
 0x1fb   : > { %2753 = vpow2.f32 %v1126_v26 }
 0x1fc   : > { %2755 = vpow2.f32 %v1132_v32  ;;  %v1121_v38 = vsub.f32 0.0, %v1113_v35  ;;  %v1112_v6 = vand.u32 2147483647, %v3412_v36  ;;  %v1130_v40 = vmul.f32 1.442695, %v1118_v37 }
 0x1fe   : > { %v1136_v41 = vmul.f32 1.442695, %v1121_v38  ;;  %v1120_v34 = vsub.f32 0.0, %v1112_v6  ;;  %2757 = vpow2.f32 %v1130_v40 }
 0x200   : > { %2759 = vpow2.f32 %v1136_v41  ;;  %v1134_v43 = vmul.f32 1.442695, %v1120_v34 }
 0x201   : > { %v2748_v46 = vpop.eup %2747 }
 0x202   : > { %2761 = vpow2.f32 %v1134_v43  ;;  %v1147_v62 = vadd.f32 1.0, %v2748_v46  ;;  %v1150_v32 = vmul.f32 -0.5, %v2748_v46 }
 0x203   : > { %v2750_v63 = vpop.eup %2749 }
 0x204   : > { %2763 = vlog2.f32 %v1147_v62  ;;  %v1138_v4 = vadd.f32 1.0, %v2750_v63  ;;  %v1141_v38 = vmul.f32 -0.5, %v2750_v63  ;;  %v1151_v41 = vadd.f32 1.0, %v1150_v32 }
 0x205   : > { %v2752_v22 = vpop.eup %2751  ;;  %v1144_v55 = vand.u32 2147483647, %v2750_v63  ;;  %v1099_v32 = vmax.f32 %v3391_v23, 0.0 }
 0x206   : > { %2765 = vlog2.f32 %v1138_v4  ;;  %v1165_v1 = vadd.f32 1.0, %v2752_v22  ;;  %v1168_v34 = vmul.f32 -0.5, %v2752_v22  ;;  %v1153_v4 = vand.u32 2147483647, %v2748_v46 }
 0x207   : > { %v1152_v52 = vmul.f32 %v2748_v46, %v1151_v41  ;;  %v1171_v7 = vand.u32 2147483647, %v2752_v22  ;;  %vm3432_vm3 = vcmp.lt.f32.partialorder %v1144_v55, 0.0004427343 }
 0x208   : > { %v2754_v26 = vpop.eup %2753  ;;  %2767 = vlog2.f32 %v1165_v1  ;;  %v1142_v1 = vadd.f32 1.0, %v1141_v38  ;;  %v1169_v50 = vadd.f32 1.0, %v1168_v34  ;;  %vm1154_vm2 = vcmp.lt.f32.partialorder %v1153_v4, 0.0004427343 }
 0x209   : > { %v3415_v28 = vpop.eup %2755  ;;  %v1156_v29 = vadd.f32 1.0, %v2754_v26  ;;  %v1159_v12 = vmul.f32 -0.5, %v2754_v26  ;;  %vm1172_vm4 = vcmp.lt.f32.partialorder %v1171_v7, 0.0004427343 }
 0x20a   : > { %v1183_v35 = vadd.f32 1.0, %v3415_v28  ;;  %v1186_v15 = vmul.f32 -0.5, %v3415_v28  ;;  %v1143_v38 = vmul.f32 %v2750_v63, %v1142_v1  ;;  %v1170_v34 = vmul.f32 %v2752_v22, %v1169_v50 }
 0x20b   : > { %2769 = vlog2.f32 %v1156_v29  ;;  %v3418_v37 = vpop.eup %2757  ;;  %v1160_v47 = vadd.f32 1.0, %v1159_v12 }
 0x20c   : > { %2771 = vlog2.f32 %v1183_v35  ;;  %v1174_v40 = vadd.f32 1.0, %v3418_v37  ;;  %v1177_v46 = vmul.f32 -0.5, %v3418_v37  ;;  %v1187_v12 = vadd.f32 1.0, %v1186_v15 }
 0x20d   : > { %v3420_v6 = vpop.eup %2759  ;;  %v1161_v63 = vmul.f32 %v2754_v26, %v1160_v47  ;;  %v1180_v7 = vand.u32 2147483647, %v3418_v37 }
 0x20e   : > { %v1201_v43 = vadd.f32 1.0, %v3420_v6  ;;  %2773 = vlog2.f32 %v1174_v40  ;;  %v1204_v1 = vmul.f32 -0.5, %v3420_v6 }
 0x20f   : > { %v3424_v62 = vpop.eup %2761  ;;  %vm1181_vm7 = vcmp.lt.f32.partialorder %v1180_v7, 0.0004427343 }
 0x210   : > { %v1192_v29 = vadd.f32 1.0, %v3424_v62  ;;  %2775 = vlog2.f32 %v1201_v43  ;;  %v1098_v43 = vmax.f32 %v3394_v27, 0.0  ;;  %v1195_v4 = vmul.f32 -0.5, %v3424_v62 }
 0x211   : > { %v2764_v56 = vpop.eup %2763 }
 0x212   : > { %v1149_v35 = vmul.f32 0.6931472, %v2764_v56  ;;  %2777 = vlog2.f32 %v1192_v29  ;;  %v1178_v29 = vadd.f32 1.0, %v1177_v46  ;;  %v1207_v56 = vand.u32 2147483647, %v3420_v6 }
 0x213   : > { %v2766_v58 = vpop.eup %2765 }
 0x214   : > { %v1155_v51 = vsel %vm1154_vm2, %v1152_v52, %v1149_v35  ;;  %v1140_v40 = vmul.f32 0.6931472, %v2766_v58  ;;  %v1162_v52 = vand.u32 2147483647, %v2754_v26  ;;  %v1101_v58 = vmax.f32 %v3397_v33, 0.0 }
 0x215   : > { %v2768_v49 = vpop.eup %2767  ;;  %v3430_v61 = vadd.f32 %v1155_v51, %v1099_v32  ;;  %v1189_v51 = vand.u32 2147483647, %v3415_v28  ;;  %v1100_v35 = vmax.f32 %v3400_v39, 0.0  ;;  %v1188_v26 = vmul.f32 %v3415_v28, %v1187_v12 }
 0x216   : > { %v1146_v23 = vsel %vm3432_vm3, %v1143_v38, %v1140_v40  ;;  %v1167_v41 = vmul.f32 0.6931472, %v2768_v49  ;;  %vm1163_vm5 = vcmp.lt.f32.partialorder %v1162_v52, 0.0004427343  ;;  %v1196_v38 = vadd.f32 1.0, %v1195_v4 }
 0x217   : > { %1236 = vrot.lane.b32.xlu0 %v3430_v61, %s2924_s25  ;;  %v3445_v50 = vadd.f32 %v1146_v23, %v1098_v43  ;;  %vm3456_vm6 = vcmp.lt.f32.partialorder %v1189_v51, 0.0004427343  ;;  %v1205_v43 = vadd.f32 1.0, %v1204_v1  ;;  %v1102_v52 = vmax.f32 %v3406_v3, 0.0 }
 0x218   : > { %v2770_v55 = vpop.eup %2769  ;;  %v1173_v27 = vsel %vm1172_vm4, %v1170_v34, %v1167_v41  ;;  %v1179_v41 = vmul.f32 %v3418_v37, %v1178_v29  ;;  %v1198_v34 = vand.u32 2147483647, %v3424_v62  ;;  %v1103_v51 = vmax.f32 %v3402_v42, 0.0 }
 0x219   : > { %v2772_v49 = vpop.eup %2771  ;;  %v3447_v22 = vadd.f32 %v1173_v27, %v1101_v58  ;;  %v1158_v33 = vmul.f32 0.6931472, %v2770_v55  ;;  %v1197_v37 = vmul.f32 %v3424_v62, %v1196_v38  ;;  %v1206_v4 = vmul.f32 %v3420_v6, %v1205_v43 }
 0x21a   : > { %v1185_v15 = vmul.f32 0.6931472, %v2772_v49  ;;  %v1104_v3 = vmax.f32 %v3412_v36, 0.0  ;;  %vm1199_vm8 = vcmp.lt.f32.partialorder %v1198_v34, 0.0004427343  ;;  %v3493_v36 = vmul.f32 %v3445_v50, %v3249_v31 }
 0x21b   : > { %1234 = vrot.lane.b32.xlu0 %v3445_v50, %s2924_s25  ;;  %1240 = vrot.lane.b32.xlu1 %v3447_v22, %s2924_s25  ;;  %v1164_v47 = vsel %vm1163_vm5, %v1161_v63, %v1158_v33  ;;  %v2774_v32 = vpop.eup %2773  ;;  %vm1208_vm9 = vcmp.lt.f32.partialorder %v1207_v56, 0.0004427343  ;;  %v1105_v33 = vmax.f32 %v3408_v24, 0.0  ;;  %v3497_v24 = vmul.f32 %v3430_v61, %v3262_v54 }
 0x21c   : > { %v3461_v39 = vadd.f32 %v1164_v47, %v1100_v35  ;;  %v1176_v23 = vmul.f32 0.6931472, %v2774_v32  ;;  %v1191_v28 = vsel %vm3456_vm6, %v1188_v26, %v1185_v15  ;;  %v3509_v7 = vmul.f32 %v3447_v22, %v3286_v25  ;;  %v3539_v32 = vpop.f32.mrf.mxu0 }
 0x21d   : > { %v2776_v46 = vpop.eup %2775  ;;  %v3476_v1 = vadd.f32 %v1191_v28, %v1103_v51  ;;  %v4129_v51 = vsub.s32 3, %v3126_v48 }
 0x21e   : > { %v1203_v58 = vmul.f32 0.6931472, %v2776_v46  ;;  %v1182_v55 = vsel %vm1181_vm7, %v1179_v41, %v1176_v23  ;;  %v3505_v6 = vmul.f32 %v3461_v39, %v3274_v45  ;;  %v3541_v40 = vpop.f32.mrf.mxu0  ;;  %v1306_v46 = vld [vmem:[%s4057_s6] sm:$0xf]  ;;  %v4126_v41 = vsub.s32 0, %v3126_v48 }
 0x21f   : > { %v2778_v12 = vpop.eup %2777  ;;  %1238 = vrot.lane.b32.xlu1 %v3461_v39, %s2924_s25  ;;  %v3471_v27 = vadd.f32 %v1182_v55, %v1102_v52  ;;  %v3521_v35 = vmul.f32 %v3476_v1, %v3310_v44  ;;  %v4127_v52 = vsub.s32 1, %v3126_v48  ;;  %v3568_v55 = vrot.slane %v1306_v46, %v4129_v51 }
 0x220   : > { %v1194_v63 = vmul.f32 0.6931472, %v2778_v12  ;;  %v1209_v49 = vsel %vm1208_vm9, %v1206_v4, %v1203_v58  ;;  %v3543_v38 = vpop.f32.mrf.mxu0  ;;  %v3556_v34 = vrot.slane %v1306_v46, %v4126_v41  ;;  %v4128_v58 = vsub.s32 2, %v3126_v48 }
 0x221   : > { %1242 = vrot.lane.b32.xlu0 %v3471_v27, %s2924_s25  ;;  %v3485_v62 = vadd.f32 %v1209_v49, %v1105_v33  ;;  %v3517_v15 = vmul.f32 %v3471_v27, %v3298_v30  ;;  %v3560_v28 = vrot.slane %v1306_v46, %v4127_v52 }
 0x222   : > { %v1200_v42 = vsel %vm1199_vm8, %v1197_v37, %v1194_v63  ;;  %v3545_v43 = vpop.f32.mrf.mxu0  ;;  %v3564_v12 = vrot.slane %v1306_v46, %v4128_v58 }
 0x223   : > { %1244 = vrot.lane.b32.xlu1 %v3476_v1, %s2924_s25  ;;  %v3483_v29 = vadd.f32 %v1200_v42, %v1104_v3  ;;  %v3533_v26 = vmul.f32 %v3485_v62, %v3334_v5 }
 0x224   : > { %v3547_v56 = vpop.f32.mrf.mxu0 }
 0x225   : > { %1246 = vrot.lane.b32.xlu0 %v3483_v29, %s2924_s25  ;;  %v3529_v47 = vmul.f32 %v3483_v29, %v3322_v2  ;;  %4125 = vst [vmem:[#allocation24_spill] sm:$0xff] %v3533_v26 }
 0x226   : > { %v3552_v23 = vpop.f32.mrf.mxu0 }
 0x227   : > { %1248 = vrot.lane.b32.xlu1 %v3485_v62, %s2924_s25 }
 0x228   : > { %v3572_v4 = vpop.f32.mrf.mxu0 }
 0x229   : > { %1274 = vrot.lane.b32.xlu0 %v3493_v36, %s2924_s25 }
 0x22b   : > { %1276 = vrot.lane.b32.xlu1 %v3497_v24, %s2924_s25 }
 0x22d   : > { %1278 = vrot.lane.b32.xlu0 %v3505_v6, %s2924_s25 }
 0x22f   : > { %1280 = vrot.lane.b32.xlu1 %v3509_v7, %s2924_s25 }
 0x231   : > { %1282 = vrot.lane.b32.xlu0 %v3517_v15, %s2924_s25 }
 0x233   : > { %1284 = vrot.lane.b32.xlu1 %v3521_v35, %s2924_s25 }
 0x235   : > { %1286 = vrot.lane.b32.xlu0 %v3529_v47, %s2924_s25 }
 0x237   : > { %1288 = vrot.lane.b32.xlu1 %v3533_v26, %s2924_s25 }
 0x289   : > { %v1237_v63 = vpop.permute.xlu0 %1236 }
 0x28a   : > { %v1259_v37 = vsel %vm502_vm1, %v3430_v61, %v1237_v63  ;;  %v3582_v63 = vpop.f32.mrf.mxu0 }
 0x28b   : > { %v1332_v3 = vmul.f32 %v3556_v34, %v1259_v37  ;;  %v1333_v42 = vmul.f32 %v3560_v28, %v1259_v37  ;;  %v1334_v49 = vmul.f32 %v3564_v12, %v1259_v37  ;;  %v1335_v33 = vmul.f32 %v3568_v55, %v1259_v37 }
 0x28c   : > { %v3592_v25 = vpop.f32.mrf.mxu0 }
 0x28d   : > { %v1368_v41 = vmul.f32 1.442695, %v1332_v3  ;;  %v1370_v52 = vmul.f32 1.442695, %v1333_v42  ;;  %v1372_v58 = vmul.f32 1.442695, %v1334_v49  ;;  %v1235_v53 = vpop.permute.xlu0 %1234  ;;  %v1241_v46 = vpop.permute.xlu1 %1240 }
 0x28e   : > { %v1374_v51 = vmul.f32 1.442695, %v1335_v33  ;;  %v1258_v5 = vsel %vm502_vm1, %v3445_v50, %v1235_v53  ;;  %v1261_v61 = vsel %vm502_vm1, %v3447_v22, %v1241_v46 }
 0x28f   : > { %2779 = vpow2.f32 %v1368_v41  ;;  %v1328_v2 = vmul.f32 %v3556_v34, %v1258_v5  ;;  %v1329_v44 = vmul.f32 %v3560_v28, %v1258_v5  ;;  %v1330_v37 = vmul.f32 %v3564_v12, %v1258_v5 }
 0x290   : > { %2781 = vpow2.f32 %v1370_v52  ;;  %v1331_v3 = vmul.f32 %v3568_v55, %v1258_v5  ;;  %v1340_v42 = vmul.f32 %v3556_v34, %v1261_v61  ;;  %v1341_v49 = vmul.f32 %v3560_v28, %v1261_v61 }
 0x291   : > { %2783 = vpow2.f32 %v1372_v58  ;;  %v1360_v53 = vmul.f32 1.442695, %v1328_v2  ;;  %v1362_v50 = vmul.f32 1.442695, %v1329_v44  ;;  %v1364_v22 = vmul.f32 1.442695, %v1330_v37  ;;  %v1239_v33 = vpop.permute.xlu1 %1238 }
 0x292   : > { %2785 = vpow2.f32 %v1374_v51  ;;  %v1366_v41 = vmul.f32 1.442695, %v1331_v3  ;;  %v1342_v46 = vmul.f32 %v3564_v12, %v1261_v61  ;;  %v1343_v30 = vmul.f32 %v3568_v55, %v1261_v61 }
 0x293   : > { %2787 = vpow2.f32 %v1360_v53  ;;  %v1384_v52 = vmul.f32 1.442695, %v1340_v42  ;;  %v1386_v5 = vmul.f32 1.442695, %v1341_v49  ;;  %v1260_v45 = vsel %vm502_vm1, %v3461_v39, %v1239_v33  ;;  %v1243_v37 = vpop.permute.xlu0 %1242 }
 0x294   : > { %2789 = vpow2.f32 %v1362_v50  ;;  %v1388_v58 = vmul.f32 1.442695, %v1342_v46  ;;  %v1390_v2 = vmul.f32 1.442695, %v1343_v30  ;;  %v1336_v44 = vmul.f32 %v3556_v34, %v1260_v45  ;;  %v3604_v30 = vpop.f32.mrf.mxu0 }
 0x295   : > { %2791 = vpow2.f32 %v1364_v22  ;;  %v1337_v51 = vmul.f32 %v3560_v28, %v1260_v45  ;;  %v1338_v3 = vmul.f32 %v3564_v12, %v1260_v45  ;;  %v1339_v61 = vmul.f32 %v3568_v55, %v1260_v45  ;;  %v1245_v54 = vpop.permute.xlu1 %1244 }
 0x296   : > { %2793 = vpow2.f32 %v1366_v41  ;;  %v1376_v42 = vmul.f32 1.442695, %v1336_v44  ;;  %v1262_v49 = vsel %vm502_vm1, %v3471_v27, %v1243_v37  ;;  %v1263_v39 = vsel %vm502_vm1, %v3476_v1, %v1245_v54 }
 0x297   : > { %2795 = vpow2.f32 %v1384_v52  ;;  %v1378_v53 = vmul.f32 1.442695, %v1337_v51  ;;  %v1380_v50 = vmul.f32 1.442695, %v1338_v3  ;;  %v1382_v22 = vmul.f32 1.442695, %v1339_v61  ;;  %v1247_v46 = vpop.permute.xlu0 %1246 }
 0x298   : > { %2797 = vpow2.f32 %v1386_v5  ;;  %v1344_v33 = vmul.f32 %v3556_v34, %v1262_v49  ;;  %v1345_v45 = vmul.f32 %v3560_v28, %v1262_v49  ;;  %v1346_v41 = vmul.f32 %v3564_v12, %v1262_v49  ;;  %v3612_v5 = vpop.f32.mrf.mxu0 }
 0x299   : > { %2799 = vpow2.f32 %v1388_v58  ;;  %v1347_v27 = vmul.f32 %v3568_v55, %v1262_v49  ;;  %v1348_v44 = vmul.f32 %v3556_v34, %v1263_v39  ;;  %v1349_v54 = vmul.f32 %v3560_v28, %v1263_v39  ;;  %v1249_v1 = vpop.permute.xlu1 %1248 }
 0x29a   : > { %2801 = vpow2.f32 %v1390_v2  ;;  %v1392_v52 = vmul.f32 1.442695, %v1344_v33  ;;  %v1394_v37 = vmul.f32 1.442695, %v1345_v45  ;;  %v1396_v51 = vmul.f32 1.442695, %v1346_v41 }
 0x29b   : > { %2803 = vpow2.f32 %v1376_v42  ;;  %v1398_v3 = vmul.f32 1.442695, %v1347_v27  ;;  %v1350_v61 = vmul.f32 %v3564_v12, %v1263_v39  ;;  %v1351_v31 = vmul.f32 %v3568_v55, %v1263_v39  ;;  %v1275_v21 = vpop.permute.xlu0 %1274 }
 0x29c   : > { %v2780_v58 = vpop.eup %2779  ;;  %2805 = vpow2.f32 %v1378_v53  ;;  %v1400_v49 = vmul.f32 1.442695, %v1348_v44  ;;  %v1402_v48 = vmul.f32 1.442695, %v1349_v54  ;;  %v1264_v19 = vsel %vm502_vm1, %v3483_v29, %v1247_v46  ;;  %v3622_v29 = vpop.f32.mrf.mxu0 }
 0x29d   : > { %v2782_v2 = vpop.eup %2781  ;;  %1428 = vst [vmem:[#allocation3 + $0x20] sm:$0xff] %v2780_v58  ;;  %2807 = vpow2.f32 %v1380_v50  ;;  %v1404_v33 = vmul.f32 1.442695, %v1350_v61  ;;  %v1406_v45 = vmul.f32 1.442695, %v1351_v31  ;;  %v1352_v42 = vmul.f32 %v3556_v34, %v1264_v19  ;;  %v1277_v41 = vpop.permute.xlu1 %1276 }
 0x29e   : > { %v2784_v27 = vpop.eup %2783  ;;  %1429 = vst [vmem:[#allocation3 + $0x28] sm:$0xff] %v2782_v2  ;;  %2809 = vpow2.f32 %v1382_v22  ;;  %v1353_v39 = vmul.f32 %v3560_v28, %v1264_v19  ;;  %v1354_v53 = vmul.f32 %v3564_v12, %v1264_v19  ;;  %v1355_v44 = vmul.f32 %v3568_v55, %v1264_v19 }
 0x29f   : > { %v2786_v54 = vpop.eup %2785  ;;  %1430 = vst [vmem:[#allocation3 + $0x30] sm:$0xff] %v2784_v27  ;;  %2811 = vpow2.f32 %v1392_v52  ;;  %v1408_v50 = vmul.f32 1.442695, %v1352_v42  ;;  %v1265_v31 = vsel %vm502_vm1, %v3485_v62, %v1249_v1  ;;  %v1298_v46 = vsel %vm502_vm1, %v3493_v36, %v1275_v21  ;;  %v1279_v19 = vpop.permute.xlu0 %1278 }
 0x2a0   : > { %v2788_v61 = vpop.eup %2787  ;;  %1431 = vst [vmem:[#allocation3 + $0x38] sm:$0xff] %v2786_v54  ;;  %2813 = vpow2.f32 %v1394_v37  ;;  %v1410_v22 = vmul.f32 1.442695, %v1353_v39  ;;  %v3628_v58 = vmul.f32 1.442695, %v1354_v53  ;;  %v1356_v52 = vmul.f32 %v3556_v34, %v1265_v31  ;;  %v3638_v53 = vpop.f32.mrf.mxu0 }
 0x2a1   : > { %v3630_v2 = vmul.f32 1.442695, %v1355_v44  ;;  %v2790_v26 = vpop.eup %2789  ;;  %1424 = vst [vmem:[#allocation3] sm:$0xff] %v2788_v61  ;;  %2815 = vpow2.f32 %v1396_v51  ;;  %v1357_v42 = vmul.f32 %v3560_v28, %v1265_v31  ;;  %v1358_v62 = vmul.f32 %v3564_v12, %v1265_v31  ;;  %v1281_v1 = vpop.permute.xlu1 %1280 }
 0x2a2   : > { %v2792_v21 = vpop.eup %2791  ;;  %1425 = vst [vmem:[#allocation3 + $0x8] sm:$0xff] %v2790_v26  ;;  %2817 = vpow2.f32 %v1398_v3  ;;  %v1359_v36 = vmul.f32 %v3568_v55, %v1265_v31  ;;  %v1456_v37 = vmul.f32 %v1298_v46, %v3356_v8  ;;  %v1457_v27 = vmul.f32 %v1298_v46, %v3358_v9 }
 0x2a3   : > { %v2794_v39 = vpop.eup %2793  ;;  %1426 = vst [vmem:[#allocation3 + $0x10] sm:$0xff] %v2792_v21  ;;  %2819 = vpow2.f32 %v1400_v49  ;;  %v3640_v34 = vmul.f32 1.442695, %v1356_v52  ;;  %v3642_v28 = vmul.f32 1.442695, %v1357_v42  ;;  %v1458_v8 = vmul.f32 %v1298_v46, %v3539_v32  ;;  %v1283_v55 = vpop.permute.xlu0 %1282 }
 0x2a4   : > { %v3644_v12 = vmul.f32 1.442695, %v1358_v62  ;;  %v2796_v51 = vpop.eup %2795  ;;  %1427 = vst [vmem:[#allocation3 + $0x18] sm:$0xff] %v2794_v39  ;;  %2821 = vpow2.f32 %v1402_v48  ;;  %v3646_v26 = vmul.f32 1.442695, %v1359_v36  ;;  %v1459_v9 = vmul.f32 %v1298_v46, %v3541_v40  ;;  %1488 = vst [vmem:[#allocation4] sm:$0xff] %v1456_v37 }
 0x2a5   : > { %1489 = vst [vmem:[#allocation4 + $0x8] sm:$0xff] %v1457_v27  ;;  %v2798_v3 = vpop.eup %2797  ;;  %1436 = vst [vmem:[#allocation3 + $0x60] sm:$0xff] %v2796_v51  ;;  %2823 = vpow2.f32 %v1404_v33  ;;  %v1299_v49 = vsel %vm502_vm1, %v3497_v24, %v1277_v41  ;;  %v1300_v44 = vsel %vm502_vm1, %v3505_v6, %v1279_v19  ;;  %v1301_v48 = vsel %vm502_vm1, %v3509_v7, %v1281_v1  ;;  %v1285_v31 = vpop.permute.xlu1 %1284  ;;  %v4131_v36 = vld [vmem:[#allocation22_spill] sm:$0xff]  ;;  %v4132_v37 = vld [vmem:[#allocation23_spill] sm:$0xff] }
 0x2a6   : > { %v2800_v54 = vpop.eup %2799  ;;  %1437 = vst [vmem:[#allocation3 + $0x68] sm:$0xff] %v2798_v3  ;;  %2825 = vpow2.f32 %v1406_v45  ;;  %1490 = vst [vmem:[#allocation4 + $0x10] sm:$0xff] %v1458_v8  ;;  %v1460_v32 = vmul.f32 %v1299_v49, %v3360_v57  ;;  %v1461_v40 = vmul.f32 %v1299_v49, %v3362_v11  ;;  %v1462_v33 = vmul.f32 %v1299_v49, %v3543_v38  ;;  %v3659_v24 = vpop.f32.mrf.mxu0 }
 0x2a7   : > { %1491 = vst [vmem:[#allocation4 + $0x18] sm:$0xff] %v1459_v9  ;;  %v2802_v46 = vpop.eup %2801  ;;  %1438 = vst [vmem:[#allocation3 + $0x70] sm:$0xff] %v2800_v54  ;;  %2827 = vpow2.f32 %v1408_v50  ;;  %v1463_v6 = vmul.f32 %v1299_v49, %v3545_v43  ;;  %v1464_v7 = vmul.f32 %v1300_v44, %v3364_v10  ;;  %v1465_v45 = vmul.f32 %v1300_v44, %v3366_v13  ;;  %v1287_v61 = vpop.permute.xlu0 %1286 }
 0x2a8   : > { %v2804_v41 = vpop.eup %2803  ;;  %1439 = vst [vmem:[#allocation3 + $0x78] sm:$0xff] %v2802_v46  ;;  %2829 = vpow2.f32 %v1410_v22  ;;  %1492 = vst [vmem:[#allocation4 + $0x20] sm:$0xff] %v1460_v32  ;;  %v1466_v57 = vmul.f32 %v1300_v44, %v3547_v56  ;;  %v1467_v11 = vmul.f32 %v1300_v44, %v3552_v23  ;;  %v1468_v38 = vmul.f32 %v1301_v48, %v3368_v60 }
 0x2a9   : > { %1493 = vst [vmem:[#allocation4 + $0x28] sm:$0xff] %v1461_v40  ;;  %1494 = vst [vmem:[#allocation4 + $0x30] sm:$0xff] %v1462_v33  ;;  %v2806_v50 = vpop.eup %2805  ;;  %2831 = vpow2.f32 %v3628_v58  ;;  %v1469_v10 = vmul.f32 %v1301_v48, %v3370_v14  ;;  %v1470_v13 = vmul.f32 %v1301_v48, %v3572_v4  ;;  %v1471_v43 = vmul.f32 %v1301_v48, %v3582_v63  ;;  %v973_v4 = vpop.f32.mrf.mxu0 }
 0x2aa   : > { %1432 = vst [vmem:[#allocation3 + $0x40] sm:$0xff] %v2804_v41  ;;  %1495 = vst [vmem:[#allocation4 + $0x38] sm:$0xff] %v1463_v6  ;;  %v2808_v22 = vpop.eup %2807  ;;  %2833 = vpow2.f32 %v3630_v2  ;;  %v1302_v60 = vsel %vm502_vm1, %v3517_v15, %v1283_v55  ;;  %v1303_v56 = vsel %vm502_vm1, %v3521_v35, %v1285_v31  ;;  %v1304_v14 = vsel %vm502_vm1, %v3529_v47, %v1287_v61  ;;  %v1289_v52 = vpop.permute.xlu1 %1288 }
 0x2ab   : > { %1496 = vst [vmem:[#allocation4 + $0x40] sm:$0xff] %v1464_v7  ;;  %1497 = vst [vmem:[#allocation4 + $0x48] sm:$0xff] %v1465_v45  ;;  %v2810_v23 = vpop.eup %2809  ;;  %2835 = vpow2.f32 %v3640_v34  ;;  %v1472_v63 = vmul.f32 %v1302_v60, %v3372_v16  ;;  %v1473_v58 = vmul.f32 %v1302_v60, %v3374_v59  ;;  %v1474_v15 = vmul.f32 %v1302_v60, %v3592_v25  ;;  %v975_v21 = vpop.f32.mrf.mxu0 }
 0x2ac   : > { %1433 = vst [vmem:[#allocation3 + $0x48] sm:$0xff] %v2806_v50  ;;  %1498 = vst [vmem:[#allocation4 + $0x50] sm:$0xff] %v1466_v57  ;;  %v2812_v2 = vpop.eup %2811  ;;  %2837 = vpow2.f32 %v3642_v28  ;;  %v1475_v35 = vmul.f32 %v1302_v60, %v3604_v30  ;;  %v1476_v47 = vmul.f32 %v1303_v56, %v3376_v0  ;;  %v1477_v19 = vmul.f32 %v1303_v56, %v3378_v17 }
 0x2ad   : > { %1499 = vst [vmem:[#allocation4 + $0x58] sm:$0xff] %v1467_v11  ;;  %1500 = vst [vmem:[#allocation4 + $0x60] sm:$0xff] %v1468_v38  ;;  %v2814_v42 = vpop.eup %2813  ;;  %2839 = vpow2.f32 %v3644_v12  ;;  %v1478_v25 = vmul.f32 %v1303_v56, %v3612_v5  ;;  %v1479_v16 = vmul.f32 %v1303_v56, %v3622_v29  ;;  %v1480_v59 = vmul.f32 %v1304_v14, %v3380_v18  ;;  %v4130_v18 = vld [vmem:[#allocation24_spill] sm:$0xff] }
 0x2ae   : > { %1434 = vst [vmem:[#allocation3 + $0x50] sm:$0xff] %v2808_v22  ;;  %1501 = vst [vmem:[#allocation4 + $0x68] sm:$0xff] %v1469_v10  ;;  %v2816_v62 = vpop.eup %2815  ;;  %2841 = vpow2.f32 %v3646_v26  ;;  %v1481_v0 = vmul.f32 %v1304_v14, %v3382_v20  ;;  %v1482_v17 = vmul.f32 %v1304_v14, %v3638_v53  ;;  %v1483_v30 = vmul.f32 %v1304_v14, %v3659_v24 }
 0x2af   : > { %1502 = vst [vmem:[#allocation4 + $0x70] sm:$0xff] %v1470_v13  ;;  %1503 = vst [vmem:[#allocation4 + $0x78] sm:$0xff] %v1471_v43  ;;  %v2818_v1 = vpop.eup %2817  ;;  %v1305_v5 = vsel %vm502_vm1, %v4130_v18, %v1289_v52  ;;  %v3698_v48 = vmov 0.0   ;;  %v3700_v54 = vmov 0.0   ;;  %v3702_v32 = vmov 0.0  }
 0x2b0   : > { %1435 = vst [vmem:[#allocation3 + $0x58] sm:$0xff] %v2810_v23  ;;  %1440 = vst [vmem:[#allocation3 + $0x80] sm:$0xff] %v2812_v2  ;;  %v2820_v29 = vpop.eup %2819  ;;  %v1484_v20 = vmul.f32 %v1305_v5, %v4131_v36  ;;  %v1485_v27 = vmul.f32 %v1305_v5, %v4132_v37  ;;  %v1486_v39 = vmul.f32 %v1305_v5, %v973_v4  ;;  %v3704_v40 = vmov 0.0  }
 0x2b1   : > { %1504 = vst [vmem:[#allocation4 + $0x80] sm:$0xff] %v1472_v63  ;;  %1505 = vst [vmem:[#allocation4 + $0x88] sm:$0xff] %v1473_v58  ;;  %v1487_v53 = vmul.f32 %v1305_v5, %v975_v21  ;;  %v2822_v34 = vpop.eup %2821 }
 0x2b2   : > { %1506 = vst [vmem:[#allocation4 + $0x90] sm:$0xff] %v1474_v15  ;;  %1441 = vst [vmem:[#allocation3 + $0x88] sm:$0xff] %v2814_v42  ;;  %v2824_v28 = vpop.eup %2823 }
 0x2b3   : > { %1507 = vst [vmem:[#allocation4 + $0x98] sm:$0xff] %v1475_v35  ;;  %1508 = vst [vmem:[#allocation4 + $0xa0] sm:$0xff] %v1476_v47  ;;  %v2826_v12 = vpop.eup %2825 }
 0x2b4   : > { %1509 = vst [vmem:[#allocation4 + $0xa8] sm:$0xff] %v1477_v19  ;;  %1442 = vst [vmem:[#allocation3 + $0x90] sm:$0xff] %v2816_v62  ;;  %v2828_v51 = vpop.eup %2827 }
 0x2b5   : > { %1510 = vst [vmem:[#allocation4 + $0xb0] sm:$0xff] %v1478_v25  ;;  %1511 = vst [vmem:[#allocation4 + $0xb8] sm:$0xff] %v1479_v16  ;;  %v2830_v26 = vpop.eup %2829 }
 0x2b6   : > { %1512 = vst [vmem:[#allocation4 + $0xc0] sm:$0xff] %v1480_v59  ;;  %1443 = vst [vmem:[#allocation3 + $0x98] sm:$0xff] %v2818_v1  ;;  %v2832_v8 = vpop.eup %2831 }
 0x2b7   : > { %1513 = vst [vmem:[#allocation4 + $0xc8] sm:$0xff] %v1481_v0  ;;  %1514 = vst [vmem:[#allocation4 + $0xd0] sm:$0xff] %v1482_v17  ;;  %v2834_v9 = vpop.eup %2833 }
 0x2b8   : > { %1515 = vst [vmem:[#allocation4 + $0xd8] sm:$0xff] %v1483_v30  ;;  %1444 = vst [vmem:[#allocation3 + $0xa0] sm:$0xff] %v2820_v29  ;;  %v2836_v55 = vpop.eup %2835 }
 0x2b9   : > { %1445 = vst [vmem:[#allocation3 + $0xa8] sm:$0xff] %v2822_v34  ;;  %1516 = vst [vmem:[#allocation4 + $0xe0] sm:$0xff] %v1484_v20  ;;  %v2838_v3 = vpop.eup %2837 }
 0x2ba   : > { %1517 = vst [vmem:[#allocation4 + $0xe8] sm:$0xff] %v1485_v27  ;;  %1518 = vst [vmem:[#allocation4 + $0xf0] sm:$0xff] %v1486_v39  ;;  %v2840_v49 = vpop.eup %2839 }
 0x2bb   : > { %1519 = vst [vmem:[#allocation4 + $0xf8] sm:$0xff] %v1487_v53  ;;  %1446 = vst [vmem:[#allocation3 + $0xb0] sm:$0xff] %v2824_v28  ;;  %v2842_v44 = vpop.eup %2841 }
 0x2bc   : > { %1447 = vst [vmem:[#allocation3 + $0xb8] sm:$0xff] %v2826_v12  ;;  %1448 = vst [vmem:[#allocation3 + $0xc0] sm:$0xff] %v2828_v51 }
 0x2bd   : > { %1449 = vst [vmem:[#allocation3 + $0xc8] sm:$0xff] %v2830_v26  ;;  %1450 = vst [vmem:[#allocation3 + $0xd0] sm:$0xff] %v2832_v8 }
 0x2be   : > { %1451 = vst [vmem:[#allocation3 + $0xd8] sm:$0xff] %v2834_v9  ;;  %1452 = vst [vmem:[#allocation3 + $0xe0] sm:$0xff] %v2836_v55 }
 0x2bf   : > { %1453 = vst [vmem:[#allocation3 + $0xe8] sm:$0xff] %v2838_v3  ;;  %1454 = vst [vmem:[#allocation3 + $0xf0] sm:$0xff] %v2840_v49 }
 0x2c0   : > { %1455 = vst [vmem:[#allocation3 + $0xf8] sm:$0xff] %v2842_v44 }
 0x2c1 LB: >> { %s2486_s30 = sshll.u32 %s2921_s28, 3  ;;  %v4133_v33 = vld [vmem:[#allocation6_spill] sm:$0xff]  ;;  %vm1558_vm10 = vcmask 1040384   ;;  %vm1603_vm11 = vcmask 1041408   ;;  %vm1648_vm12 = vcmask 1043456   ;;  %s1525_s28 = sadd.s32 1, %s2921_s28   ;;  %s2921_s28 = sphi %s3706_s28, %s1525_s28   ;;  %v2917_v40 = vphi %v3704_v40, %v1701_v40   ;;  %v2913_v32 = vphi %v3702_v32, %v4134_v32   ;;  %v2909_v54 = vphi %v3700_v54, %v1703_v54   ;;  %v2905_v48 = vphi %v3698_v48, %v1704_v48  }
 0x2c2   : >> { %v3725_v31 = vsub.s32 7, %v4133_v33  ;;  %s1531_s11 = sshra.s32 %s2486_s30, 3  ;;  %p1522_p4 = scmp.ge.s32.totalorder %s1525_s28, 8  }
 0x2c3   : >> { %s2527_s12 = sshll.u32 %s1531_s11, 5 }
 0x2c4   : >> { %s1535_s14 = scalar_lea.vmem [#allocation3], %s2527_s12  ;;  %s3727_s15 = scalar_lea.vmem [#allocation4], %s2527_s12  ;;  %v1684_v6 = vrot.slane %v2917_v40, %v3725_v31  ;;  %v1688_v38 = vrot.slane %v2913_v32, %v3725_v31  ;;  %v1692_v22 = vrot.slane %v2909_v54, %v3725_v31 }
 0x2c5   : >> { %v1542_v24 = vld [vmem:[%s3727_s15] sm:$0xff]  ;;  %v1543_v57 = vld [vmem:[%s3727_s15 + $0x8] sm:$0xff]  ;;  %v1544_v50 = vld [vmem:[%s3727_s15 + $0x10] sm:$0xff] }
 0x2c6   : >> { %v1567_v41 = vrot.slane %v1542_v24, 7  ;;  %v1568_v10 = vrot.slane %v1543_v57, 7  ;;  %v1569_v43 = vrot.slane %v1544_v50, 7  ;;  %v1545_v35 = vld [vmem:[%s3727_s15 + $0x18] sm:$0xff] }
 0x2c7   : >> { %v1536_v46 = vld [vmem:[%s1535_s14] sm:$0xff]  ;;  %v1537_v7 = vld [vmem:[%s1535_s14 + $0x8] sm:$0xff]  ;;  %v1538_v61 = vld [vmem:[%s1535_s14 + $0x10] sm:$0xff]  ;;  %v1570_v30 = vrot.slane %v1545_v35, 7 }
 0x2c8   : >> { %v1550_v45 = vrot.slane %v1536_v46, 7  ;;  %v1551_v11 = vrot.slane %v1537_v7, 7  ;;  %v1552_v13 = vrot.slane %v1538_v61, 7  ;;  %v1539_v60 = vld [vmem:[%s1535_s14 + $0x18] sm:$0xff]  ;;  %v1575_v14 = vsel %vm1558_vm10, 0.0, %v1567_v41 }
 0x2c9   : >> { %v1553_v4 = vrot.slane %v1539_v60, 7  ;;  %v1579_v63 = vmul.f32 %v1575_v14, %v1536_v46  ;;  %v1576_v15 = vsel %vm1558_vm10, 0.0, %v1568_v10  ;;  %v1577_v52 = vsel %vm1558_vm10, 0.0, %v1569_v43 }
 0x2ca   : >> { %v1559_v56 = vsel %vm1558_vm10, 1.0, %v1550_v45  ;;  %v1560_v23 = vsel %vm1558_vm10, 1.0, %v1551_v11  ;;  %v1580_v47 = vmul.f32 %v1576_v15, %v1537_v7  ;;  %v1561_v19 = vsel %vm1558_vm10, 1.0, %v1552_v13 }
 0x2cb   : >> { %v1587_v58 = vmul.f32 %v1559_v56, %v1536_v46  ;;  %v1588_v2 = vmul.f32 %v1560_v23, %v1537_v7  ;;  %v1562_v42 = vsel %vm1558_vm10, 1.0, %v1553_v4  ;;  %v1583_v25 = vadd.f32 %v1579_v63, %v1542_v24 }
 0x2cc   : >> { %v1581_v62 = vmul.f32 %v1577_v52, %v1538_v61  ;;  %v1584_v0 = vadd.f32 %v1580_v47, %v1543_v57  ;;  %v1589_v17 = vmul.f32 %v1561_v19, %v1538_v61  ;;  %v1590_v1 = vmul.f32 %v1562_v42, %v1539_v60 }
 0x2cd   : >> { %v1595_v16 = vrot.slane %v1587_v58, 6  ;;  %v1596_v59 = vrot.slane %v1588_v2, 6  ;;  %v1612_v18 = vrot.slane %v1583_v25, 6  ;;  %v1578_v34 = vsel %vm1558_vm10, 0.0, %v1570_v30 }
 0x2ce   : >> { %v1585_v29 = vadd.f32 %v1581_v62, %v1544_v50  ;;  %v1613_v20 = vrot.slane %v1584_v0, 6  ;;  %v1597_v27 = vrot.slane %v1589_v17, 6  ;;  %v1598_v28 = vrot.slane %v1590_v1, 6 }
 0x2cf   : >> { %v1604_v21 = vsel %vm1603_vm11, 1.0, %v1595_v16  ;;  %v1605_v5 = vsel %vm1603_vm11, 1.0, %v1596_v59  ;;  %v1620_v39 = vsel %vm1603_vm11, 0.0, %v1612_v18  ;;  %v1582_v49 = vmul.f32 %v1578_v34, %v1539_v60  ;;  %v1732_v34 = vld [vmem:[%s4058_s7 + $0xb8] sm:$0xff] (%p1522_p4) }
 0x2d0   : >> { %v1632_v36 = vmul.f32 %v1604_v21, %v1587_v58  ;;  %v1633_v37 = vmul.f32 %v1605_v5, %v1588_v2  ;;  %v1614_v53 = vrot.slane %v1585_v29, 6  ;;  %v1624_v12 = vmul.f32 %v1620_v39, %v1587_v58  ;;  %v1735_v39 = vld [vmem:[%s4058_s7 + $0xd0] sm:$0xff] (%p1522_p4) }
 0x2d1   : >> { %v1621_v26 = vsel %vm1603_vm11, 0.0, %v1613_v20  ;;  %v1606_v55 = vsel %vm1603_vm11, 1.0, %v1597_v27  ;;  %v1586_v50 = vadd.f32 %v1582_v49, %v1545_v35  ;;  %v1607_v10 = vsel %vm1603_vm11, 1.0, %v1598_v28  ;;  %v1733_v27 = vld [vmem:[%s4058_s7 + $0xc0] sm:$0xff] (%p1522_p4) }
 0x2d2   : >> { %v1640_v51 = vrot.slane %v1632_v36, 4  ;;  %v1641_v8 = vrot.slane %v1633_v37, 4  ;;  %v1625_v9 = vmul.f32 %v1621_v26, %v1588_v2  ;;  %v1622_v3 = vsel %vm1603_vm11, 0.0, %v1614_v53  ;;  %v1730_v53 = vld [vmem:[%s4058_s7 + $0xa8] sm:$0xff] (%p1522_p4)  ;;  %v1729_v28 = vld [vmem:[%s4058_s7 + $0xa0] sm:$0xff] (%p1522_p4)  ;;  %v1728_v26 = vld [vmem:[%s4058_s7 + $0x98] sm:$0xff] (%p1522_p4) }
 0x2d3   : >> { %v1628_v44 = vadd.f32 %v1624_v12, %v1583_v25  ;;  %v1626_v24 = vmul.f32 %v1622_v3, %v1589_v17  ;;  %v1634_v57 = vmul.f32 %v1606_v55, %v1589_v17  ;;  %v1615_v23 = vrot.slane %v1586_v50, 6  ;;  %v1731_v12 = vld [vmem:[%s4058_s7 + $0xb0] sm:$0xff] (%p1522_p4)  ;;  %v1722_v55 = vld [vmem:[%s4058_s7 + $0x68] sm:$0xff] (%p1522_p4)  ;;  %v1724_v3 = vld [vmem:[%s4058_s7 + $0x78] sm:$0xff] (%p1522_p4) }
 0x2d4   : >> { %v1649_v33 = vsel %vm1648_vm12, 1.0, %v1640_v51  ;;  %v1650_v46 = vsel %vm1648_vm12, 1.0, %v1641_v8  ;;  %v1629_v45 = vadd.f32 %v1625_v9, %v1584_v0  ;;  %v1635_v4 = vmul.f32 %v1607_v10, %v1590_v1  ;;  %v1726_v51 = vld [vmem:[%s4058_s7 + $0x88] sm:$0xff] (%p1522_p4)  ;;  %v1725_v8 = vld [vmem:[%s4058_s7 + $0x80] sm:$0xff] (%p1522_p4)  ;;  %v1727_v9 = vld [vmem:[%s4058_s7 + $0x90] sm:$0xff] (%p1522_p4) }
 0x2d5   : >> { %v1677_v7 = vmul.f32 %v1649_v33, %v1632_v36  ;;  %v1678_v41 = vmul.f32 %v1650_v46, %v1633_v37  ;;  %v1657_v11 = vrot.slane %v1628_v44, 4  ;;  %v1630_v61 = vadd.f32 %v1626_v24, %v1585_v29  ;;  %v1740_v29 = vld [vmem:[%s4058_s7 + $0xf8] sm:$0xff] (%p1522_p4)  ;;  %v1721_v49 = vld [vmem:[%s4058_s7 + $0x60] sm:$0xff] (%p1522_p4)  ;;  %v1718_v33 = vld [vmem:[%s4058_s7 + $0x48] sm:$0xff] (%p1522_p4) }
 0x2d6   : >> { %v1658_v43 = vrot.slane %v1629_v45, 4  ;;  %v1642_v60 = vrot.slane %v1634_v57, 4  ;;  %v1623_v47 = vsel %vm1603_vm11, 0.0, %v1615_v23  ;;  %v1643_v25 = vrot.slane %v1635_v4, 4  ;;  %1870 = vmatprep.subr.mxu1 (%p1522_p4), %v1740_v29  ;;  %v1720_v46 = vld [vmem:[%s4058_s7 + $0x58] sm:$0xff] (%p1522_p4)  ;;  %v1717_v24 = vld [vmem:[%s4058_s7 + $0x40] sm:$0xff] (%p1522_p4) }
 0x2d7   : >> { %v1697_v13 = vmul.f32 %v1684_v6, %v1677_v7  ;;  %v1665_v56 = vsel %vm1648_vm12, 0.0, %v1657_v11  ;;  %v1659_v14 = vrot.slane %v1630_v61, 4  ;;  %v1698_v15 = vmul.f32 %v1688_v38, %v1678_v41  ;;  %v1719_v7 = vld [vmem:[%s4058_s7 + $0x50] sm:$0xff] (%p1522_p4)  ;;  %v1716_v41 = vld [vmem:[%s4058_s7 + $0x38] sm:$0xff] (%p1522_p4)  ;;  %v1709_v10 = vld [vmem:[%s4058_s7] sm:$0xff] (%p1522_p4) }
 0x2d8   : >> { %v1669_v63 = vmul.f32 %v1665_v56, %v1632_v36  ;;  %v1666_v58 = vsel %vm1648_vm12, 0.0, %v1658_v43  ;;  %v1651_v2 = vsel %vm1648_vm12, 1.0, %v1642_v60  ;;  %v1627_v42 = vmul.f32 %v1623_v47, %v1590_v1  ;;  %v1737_v36 = vld [vmem:[%s4058_s7 + $0xe0] sm:$0xff] (%p1522_p4)  ;;  %v1715_v11 = vld [vmem:[%s4058_s7 + $0x30] sm:$0xff] (%p1522_p4)  ;;  %v4137_v60 = vld [vmem:[#allocation15_spill] sm:$0xff] (%p1522_p4) }
 0x2d9   : >> { %v1670_v35 = vmul.f32 %v1666_v58, %v1633_v37  ;;  %v1667_v40 = vsel %vm1648_vm12, 0.0, %v1659_v14  ;;  %v1679_v6 = vmul.f32 %v1651_v2, %v1634_v57  ;;  %v1652_v62 = vsel %vm1648_vm12, 1.0, %v1643_v25  ;;  %v1736_v37 = vld [vmem:[%s4058_s7 + $0xd8] sm:$0xff] (%p1522_p4)  ;;  %v4136_v43 = vld [vmem:[#allocation14_spill] sm:$0xff] (%p1522_p4)  ;;  %v4138_v56 = vld [vmem:[#allocation16_spill] sm:$0xff] (%p1522_p4) }
 0x2da   : >> { %v1673_v19 = vadd.f32 %v1669_v63, %v1628_v44  ;;  %v1671_v52 = vmul.f32 %v1667_v40, %v1634_v57  ;;  %v1631_v59 = vadd.f32 %v1627_v42, %v1586_v50  ;;  %v1680_v17 = vmul.f32 %v1652_v62, %v1635_v4  ;;  %v1723_v44 = vld [vmem:[%s4058_s7 + $0x70] sm:$0xff] (%p1522_p4)  ;;  %v1713_v57 = vld [vmem:[%s4058_s7 + $0x20] sm:$0xff] (%p1522_p4)  ;;  %v1712_v50 = vld [vmem:[%s4058_s7 + $0x18] sm:$0xff] (%p1522_p4) }
 0x2db   : >> { %v1674_v16 = vadd.f32 %v1670_v35, %v1629_v45  ;;  %v1699_v32 = vmul.f32 %v1692_v22, %v1679_v6  ;;  %v1696_v30 = vrot.slane %v2905_v48, %v3725_v31  ;;  %v1738_v31 = vld [vmem:[%s4058_s7 + $0xe8] sm:$0xff] (%p1522_p4)  ;;  %v4135_v20 = vmov (%p1522_p4), 0.0   ;;  %v4140_v23 = vld [vmem:[#allocation18_spill] sm:$0xff] (%p1522_p4)  ;;  %v4142_v63 = vld [vmem:[#allocation20_spill] sm:$0xff] (%p1522_p4) }
 0x2dc   : >> { %v1701_v40 = vadd.f32 %v1697_v13, %v1673_v19   ;;  %v1675_v38 = vadd.f32 %v1671_v52, %v1630_v61  ;;  %v1660_v1 = vrot.slane %v1631_v59, 4  ;;  %1805 = vmatprep.mubr.f32.mxu0 (%p1522_p4), %v4135_v20  ;;  %1918 = vmatprep.mubr.f32.mxu1 (%p1522_p4), %v4135_v20  ;;  %v1714_v45 = vld [vmem:[%s4058_s7 + $0x28] sm:$0xff] (%p1522_p4)  ;;  %v1711_v13 = vld [vmem:[%s4058_s7 + $0x10] sm:$0xff] (%p1522_p4)  ;;  %v4145_v35 = vld [vmem:[#allocation11_spill] sm:$0xff] (%p1522_p4) }
 0x2dd   : >> { %v1702_v0 = vadd.f32 %v1698_v15, %v1674_v16   ;;  %v1700_v22 = vmul.f32 %v1696_v30, %v1680_v17  ;;  %1757 = vmatprep.subr.mxu0 (%p1522_p4), %v1738_v31  ;;  %v1710_v61 = vld [vmem:[%s4058_s7 + $0x8] sm:$0xff] (%p1522_p4)  ;;  %v4146_v6 = vld [vmem:[#allocation7_spill] sm:$0xff] (%p1522_p4)  ;;  %v4148_v42 = vld [vmem:[#allocation8_spill] sm:$0xff] (%p1522_p4) }
 0x2de   : >> { %1705 = vst [vmem:[%s3727_s15] sm:$0xff] %v1701_v40  ;;  %v1703_v54 = vadd.f32 %v1699_v32, %v1675_v38   ;;  %v1668_v21 = vsel %vm1648_vm12, 0.0, %v1660_v1  ;;  %1758 = vmatpush1.msra.mxu0 (%p1522_p4), %v1737_v36  ;;  %v4139_v14 = vld [vmem:[#allocation17_spill] sm:$0xff] (%p1522_p4)  ;;  %v2511_v40 = vmul.f32 (%p1522_p4), -1.442695, %v4145_v35  ;;  %v2507_v47 = vmul.f32 (%p1522_p4), -1.442695, %v4146_v6 }
 0x2df   : >> { %1706 = vst [vmem:[%s3727_s15 + $0x8] sm:$0xff] %v1702_v0  ;;  %v1672_v18 = vmul.f32 %v1668_v21, %v1635_v4  ;;  %v4134_v32 = vmov %v1702_v0  ;;  %v4141_v4 = vld [vmem:[#allocation19_spill] sm:$0xff] (%p1522_p4)  ;;  %v4143_v58 = vld [vmem:[#allocation21_spill] sm:$0xff] (%p1522_p4)  ;;  %v2510_v25 = vmul.f32 (%p1522_p4), -1.442695, %v4148_v42 }
 0x2e0   : >> { %1707 = vst [vmem:[%s3727_s15 + $0x10] sm:$0xff] %v1703_v54  ;;  %v1734_v54 = vld [vmem:[%s4058_s7 + $0xc8] sm:$0xff] (%p1522_p4) }
 0x2e1   : >> { %v1676_v5 = vadd.f32 %v1672_v18, %v1631_v59  ;;  %1524 = sbr.rel (!%p1522_p4) target bundleno = 705 (0x2c1), region = 99  ;;  %1759 = vmatprep.subr.mxu0 (%p1522_p4), %v1734_v54  ;;  %v4144_v15 = vld [vmem:[#allocation9_spill] sm:$0xff] (%p1522_p4) }
 0x2e2   : > { %1760 = vmatpush1.msra.mxu0 (%p1522_p4), %v1733_v27  ;;  %v2509_v2 = vmul.f32 (%p1522_p4), -1.442695, %v4144_v15  ;;  %v4147_v19 = vld [vmem:[#allocation5_spill] sm:$0xff] (%p1522_p4)  ;;  %v2221_v27 = vld [vmem:[%s4060_s9 + $0x38] sm:$0xff] (%p1522_p4) }
 0x2e3   : >> { %v1704_v48 = vadd.f32 %v1700_v22, %v1676_v5   ;;  %1761 = vmatprep.subr.mxu0 (%p1522_p4), %v1730_v53  ;;  %v2508_v52 = vmul.f32 (%p1522_p4), -1.442695, %v4147_v19  ;;  %v2219_v53 = vld [vmem:[%s4060_s9 + $0x28] sm:$0xff] (%p1522_p4) }
 0x2e4   : > { %1762 = vmatpush1.msra.mxu0 (%p1522_p4), %v1729_v28  ;;  %2843 = vpow2.f32 (%p1522_p4), %v2509_v2  ;;  %v2214_v2 = vld [vmem:[%s4060_s9] sm:$0xff] (%p1522_p4) }
 0x2e5   : >> { %1708 = vst [vmem:[%s3727_s15 + $0x18] sm:$0xff] %v1704_v48  ;;  %v1739_v48 = vld [vmem:[%s4058_s7 + $0xf0] sm:$0xff] (%p1522_p4)  ;;  %1763 = vmatprep.subr.mxu0 (%p1522_p4), %v1726_v51  ;;  %2845 = vpow2.f32 (%p1522_p4), %v2511_v40 }
 0x2e6   : > { %1871 = vmatpush1.msra.mxu1 %v1739_v48  ;;  %1764 = vmatpush1.msra.mxu0 %v1725_v8  ;;  %2847 = vpow2.f32 %v2507_v47  ;;  %v4151_v8 = vld [vmem:[#allocation10_spill] sm:$0xff] }
 0x2e7   : > { %1872 = vmatprep.subr.mxu1 %v1736_v37  ;;  %1765 = vmatprep.subr.mxu0 %v1722_v55  ;;  %2849 = vpow2.f32 %v2508_v52  ;;  %v2217_v55 = vld [vmem:[%s4060_s9 + $0x18] sm:$0xff] }
 0x2e8   : > { %1873 = vmatpush1.msra.mxu1 %v1735_v39  ;;  %1766 = vmatpush1.msra.mxu0 %v1721_v49  ;;  %2851 = vpow2.f32 %v2510_v25  ;;  %v2220_v39 = vld [vmem:[%s4060_s9 + $0x30] sm:$0xff] }
 0x2e9   : > { %1874 = vmatprep.subr.mxu1 %v1732_v34  ;;  %1767 = vmatprep.subr.mxu0 %v1718_v33  ;;  %v4149_v34 = vld [vmem:[#allocation13_spill] sm:$0xff] }
 0x2ea   : > { %1875 = vmatpush1.msra.mxu1 %v1731_v12  ;;  %1768 = vmatpush1.msra.mxu0 %v1717_v24  ;;  %v2513_v28 = vmul.f32 -1.442695, %v4149_v34  ;;  %v4150_v12 = vld [vmem:[#allocation12_spill] sm:$0xff] }
 0x2eb   : > { %1876 = vmatprep.subr.mxu1 %v1728_v26  ;;  %1769 = vmatprep.subr.mxu0 %v1714_v45  ;;  %v2514_v51 = vmul.f32 -1.442695, %v4150_v12  ;;  %v2218_v26 = vld [vmem:[%s4060_s9 + $0x20] sm:$0xff] }
 0x2ec   : > { %1877 = vmatpush1.msra.mxu1 %v1727_v9  ;;  %1770 = vmatpush1.msra.mxu0 %v1713_v57  ;;  %v2512_v9 = vmul.f32 -1.442695, %v4151_v8  ;;  %v1969_v49 = vld [vmem:[#allocation4 + $0x10] sm:$0xff]  ;;  %v1968_v24 = vld [vmem:[#allocation4 + $0x8] sm:$0xff]  ;;  %v2215_v57 = vld [vmem:[%s4060_s9 + $0x8] sm:$0xff] }
 0x2ed   : > { %1878 = vmatprep.subr.mxu1 %v1724_v3  ;;  %1771 = vmatprep.subr.mxu0 %v1710_v61  ;;  %v1967_v3 = vld [vmem:[#allocation4] sm:$0xff]  ;;  %v1972_v47 = vld [vmem:[#allocation4 + $0x28] sm:$0xff] }
 0x2ee   : > { %1879 = vmatpush1.msra.mxu1 %v1723_v44  ;;  %1772 = vmatpush1.msra.mxu0 %v1709_v10  ;;  %v2216_v44 = vld [vmem:[%s4060_s9 + $0x10] sm:$0xff]  ;;  %v1973_v10 = vld [vmem:[#allocation4 + $0x30] sm:$0xff] }
 0x2ef   : > { %1880 = vmatprep.subr.mxu1 %v1720_v46  ;;  %2490 = vmatmul.mubr.msk.f32.vlgmr.msra.gmra.mxu0 %vm502_vm1, %v4136_v43 }
 0x2f0   : > { %1881 = vmatpush1.msra.mxu1 %v1719_v7  ;;  %1811 = vmatprep.mubr.f32.mxu0 %v4135_v20  ;;  %v1970_v7 = vld [vmem:[#allocation4 + $0x18] sm:$0xff] }
 0x2f1   : > { %1882 = vmatprep.subr.mxu1 %v1716_v41  ;;  %v2844_v16 = vpop.eup %2843  ;;  %2621 = vmatprep.subr.mxu0 %v2221_v27 }
 0x2f2   : > { %1883 = vmatpush1.msra.mxu1 %v1715_v11  ;;  %v2144_v32 = vadd.f32 1.0, %v2844_v16  ;;  %v2846_v38 = vpop.eup %2845  ;;  %2622 = vmatpush3.msra.mxu0 %v2221_v27 }
 0x2f3   : > { %1884 = vmatprep.subr.mxu1 %v1712_v50  ;;  %2491 = vmatmul.mubr.msk.f32.gmra.mxu0 %vm502_vm1, %v4137_v60  ;;  %v2848_v59 = vpop.eup %2847  ;;  %v2146_v62 = vadd.f32 1.0, %v2846_v38  ;;  %v1971_v50 = vld [vmem:[#allocation4 + $0x20] sm:$0xff] }
 0x2f4   : > { %1885 = vmatpush1.msra.mxu1 %v1711_v13  ;;  %1817 = vmatprep.mubr.f32.mxu0 %v4135_v20  ;;  %2853 = vrcp.f32 %v2144_v32  ;;  %v2142_v0 = vadd.f32 1.0, %v2848_v59  ;;  %v2850_v17 = vpop.eup %2849  ;;  %v1975_v38 = vld [vmem:[#allocation4 + $0x40] sm:$0xff]  ;;  %v1977_v59 = vld [vmem:[#allocation4 + $0x50] sm:$0xff] }
 0x2f5   : > { %2498 = vmatmul.mubr.msk.f32.vlgmr.msra.gmra.mxu1 %vm502_vm1, %v4136_v43  ;;  %2855 = vrcp.f32 %v2146_v62  ;;  %v2143_v30 = vadd.f32 1.0, %v2850_v17  ;;  %v2852_v1 = vpop.eup %2851  ;;  %2649 = vmatprep.subr.mxu1 %v2221_v27 }
 0x2f6   : > { %1924 = vmatprep.mubr.f32.mxu1 %v4135_v20  ;;  %2857 = vrcp.f32 %v2142_v0  ;;  %v2145_v21 = vadd.f32 1.0, %v2852_v1  ;;  %2657 = vmatpush3.msra.mxu1 %v2221_v27 }
 0x2f7   : > { %2492 = vmatmul.mubr.msk.f32.gmra.mxu0 %vm502_vm1, %v4138_v56  ;;  %2859 = vrcp.f32 %v2143_v30  ;;  %2623 = vmatprep.subr.mxu0 %v2220_v39 }
 0x2f8   : > { %1823 = vmatprep.mubr.f32.mxu0 %v4135_v20  ;;  %2861 = vrcp.f32 %v2145_v21  ;;  %2650 = vmatprep.subr.mxu1 %v2220_v39  ;;  %v1976_v21 = vld [vmem:[#allocation4 + $0x48] sm:$0xff] }
 0x2f9   : > { %2499 = vmatmul.mubr.msk.f32.gmra.mxu1 %vm502_vm1, %v4137_v60  ;;  %2624 = vmatpush3.msra.mxu0 %v2220_v39  ;;  %2863 = vpow2.f32 %v2513_v28 }
 0x2fa   : > { %1930 = vmatprep.mubr.f32.mxu1 %v4135_v20  ;;  %2658 = vmatpush3.msra.mxu1 %v2220_v39  ;;  %2865 = vpow2.f32 %v2514_v51 }
 0x2fb   : > { %2493 = vmatmul.mubr.msk.f32.gmra.mxu0 %vm502_vm1, %v4139_v14  ;;  %2625 = vmatprep.subr.mxu0 %v2219_v53  ;;  %2867 = vpow2.f32 %v2512_v9  ;;  %v1980_v9 = vld [vmem:[#allocation4 + $0x68] sm:$0xff] }
 0x2fc   : > { %1829 = vmatprep.mubr.f32.mxu0 %v4135_v20  ;;  %2651 = vmatprep.subr.mxu1 %v2219_v53 }
 0x2fd   : > { %2500 = vmatmul.mubr.msk.f32.gmra.mxu1 %vm502_vm1, %v4138_v56  ;;  %2626 = vmatpush3.msra.mxu0 %v2219_v53 }
 0x2fe   : > { %1936 = vmatprep.mubr.f32.mxu1 %v4135_v20  ;;  %2659 = vmatpush3.msra.mxu1 %v2219_v53 }
 0x2ff   : > { %2494 = vmatmul.mubr.msk.f32.gmra.mxu0 %vm502_vm1, %v4140_v23  ;;  %2627 = vmatprep.subr.mxu0 %v2218_v26 }
 0x300   : > { %1835 = vmatprep.mubr.f32.mxu0 %v4135_v20  ;;  %2652 = vmatprep.subr.mxu1 %v2218_v26 }
 0x301   : > { %2501 = vmatmul.mubr.msk.f32.gmra.mxu1 %vm502_vm1, %v4139_v14  ;;  %v2854_v18 = vpop.eup %2853  ;;  %2628 = vmatpush3.msra.mxu0 %v2218_v26 }
 0x302   : > { %1942 = vmatprep.mubr.f32.mxu1 %v4135_v20  ;;  %v2168_v22 = vmul.f32 %v2854_v18, %v4144_v15  ;;  %v2856_v5 = vpop.eup %2855  ;;  %2660 = vmatpush3.msra.mxu1 %v2218_v26  ;;  %v1978_v18 = vld [vmem:[#allocation4 + $0x58] sm:$0xff] }
 0x303   : > { %2495 = vmatmul.mubr.msk.f32.gmra.mxu0 %vm502_vm1, %v4141_v4  ;;  %v2858_v31 = vpop.eup %2857  ;;  %v2170_v29 = vmul.f32 %v2856_v5, %v4145_v35  ;;  %2629 = vmatprep.subr.mxu0 %v2217_v55 }
 0x304   : > { %1841 = vmatprep.mubr.f32.mxu0 %v4135_v20  ;;  %2186 = vrot.lane.b32.xlu0 %v2168_v22, %s2924_s25  ;;  %v2166_v36 = vmul.f32 %v2858_v31, %v4146_v6 }
 0x305   : > { %2502 = vmatmul.mubr.msk.f32.gmra.mxu1 %vm502_vm1, %v4140_v23  ;;  %2653 = vmatprep.subr.mxu1 %v2217_v55 }
 0x306   : > { %1948 = vmatprep.mubr.f32.mxu1 %v4135_v20  ;;  %2182 = vrot.lane.b32.xlu1 %v2166_v36, %s2924_s25 }
 0x307   : > { %2496 = vmatmul.mubr.msk.f32.gmra.mxu0 %vm502_vm1, %v4142_v63  ;;  %2661 = vmatpush3.msra.mxu1 %v2217_v55 }
 0x308   : > { %1847 = vmatprep.mubr.f32.mxu0 %v4135_v20  ;;  %2190 = vrot.lane.b32.xlu0 %v2170_v29, %s2924_s25 }
 0x309   : > { %2503 = vmatmul.mubr.msk.f32.gmra.mxu1 %vm502_vm1, %v4141_v4  ;;  %2630 = vmatpush3.msra.mxu0 %v2217_v55  ;;  %v1982_v55 = vld [vmem:[#allocation4 + $0x78] sm:$0xff] }
 0x30a   : > { %1954 = vmatprep.mubr.f32.mxu1 %v4135_v20  ;;  %2631 = vmatprep.subr.mxu0 %v2216_v44 }
 0x30b   : > { %2497 = vmatmul.mubr.msk.f32.gmra.mxu0 %vm502_vm1, %v4143_v58  ;;  %2654 = vmatprep.subr.mxu1 %v2216_v44 }
 0x30c   : > { %2632 = vmatpush3.msra.mxu0 %v2216_v44  ;;  %2662 = vmatpush3.msra.mxu1 %v2216_v44 }
 0x30d   : > { %2504 = vmatmul.mubr.msk.f32.gmra.mxu1 %vm502_vm1, %v4142_v63  ;;  %2633 = vmatprep.subr.mxu0 %v2215_v57 }
 0x30e   : > { %1960 = vmatprep.mubr.f32.mxu1 %v4135_v20  ;;  %v2860_v20 = vpop.eup %2859  ;;  %2655 = vmatprep.subr.mxu1 %v2215_v57 }
 0x30f   : > { %v2167_v48 = vmul.f32 %v2860_v20, %v4147_v19  ;;  %v2862_v54 = vpop.eup %2861  ;;  %2634 = vmatpush3.msra.mxu0 %v2215_v57  ;;  %2663 = vmatpush3.msra.mxu1 %v2215_v57  ;;  %v1974_v19 = vld [vmem:[#allocation4 + $0x38] sm:$0xff]  ;;  %v1985_v57 = vld [vmem:[#allocation4 + $0x90] sm:$0xff] }
 0x310   : > { %v2169_v37 = vmul.f32 %v2862_v54, %v4148_v42  ;;  %2635 = vmatprep.subr.mxu0 %v2214_v2  ;;  %2656 = vmatprep.subr.mxu1 %v2214_v2  ;;  %v2864_v22 = vpop.eup %2863  ;;  %v1979_v54 = vld [vmem:[#allocation4 + $0x60] sm:$0xff] }
 0x311   : > { %2505 = vmatmul.mubr.msk.f32.gmra.mxu1 %vm502_vm1, %v4143_v58  ;;  %2184 = vrot.lane.b32.xlu1 %v2167_v48, %s2924_s25  ;;  %v2866_v28 = vpop.eup %2865 }
 0x312   : > { %2636 = vmatpush3.msra.mxu0 %v2214_v2  ;;  %2664 = vmatpush3.msra.mxu1 %v2214_v2  ;;  %v1984_v2 = vld [vmem:[#allocation4 + $0x88] sm:$0xff] }
 0x315   : > { %2188 = vrot.lane.b32.xlu1 %v2169_v37, %s2924_s25  ;;  %v1981_v37 = vld [vmem:[#allocation4 + $0x70] sm:$0xff] }
 0x3af   : > { %v1807_v33 = vpop.f32.mrf.mxu0 }
 0x3b0   : > { %v1999_v45 = vmul.f32 %v1967_v3, %v1807_v33  ;;  %v2148_v3 = vadd.f32 1.0, %v2864_v22 }
 0x3b1   : > { %v1809_v11 = vpop.f32.mrf.mxu0 }
 0x3b2   : > { %v2000_v13 = vmul.f32 %v1968_v24, %v1809_v11  ;;  %2869 = vrcp.f32 %v2148_v3 }
 0x3b3   : > { %v1813_v40 = vpop.f32.mrf.mxu0 }
 0x3b4   : > { %v2003_v42 = vmul.f32 %v1971_v50, %v1813_v40 }
 0x3b5   : > { %v1920_v46 = vpop.f32.mrf.mxu1  ;;  %v1815_v16 = vpop.f32.mrf.mxu0 }
 0x3b6   : > { %v2001_v41 = vmul.f32 %v1969_v49, %v1920_v46  ;;  %v2004_v62 = vmul.f32 %v1972_v47, %v1815_v16  ;;  %v2868_v49 = vpop.eup %2867  ;;  %v1987_v16 = vld [vmem:[#allocation4 + $0xa0] sm:$0xff] }
 0x3b7   : > { %v1922_v61 = vpop.f32.mrf.mxu1  ;;  %v1819_v30 = vpop.f32.mrf.mxu0  ;;  %v2147_v40 = vadd.f32 1.0, %v2868_v49 }
 0x3b8   : > { %v2002_v15 = vmul.f32 %v1970_v7, %v1922_v61  ;;  %v2031_v35 = vadd.f32 %v2001_v41, %v1999_v45  ;;  %v2007_v29 = vmul.f32 %v1975_v38, %v1819_v30  ;;  %v1983_v41 = vld [vmem:[#allocation4 + $0x80] sm:$0xff] }
 0x3b9   : > { %v1926_v6 = vpop.f32.mrf.mxu1  ;;  %v1821_v20 = vpop.f32.mrf.mxu0 }
 0x3ba   : > { %v2032_v52 = vadd.f32 %v2002_v15, %v2000_v13  ;;  %v2005_v25 = vmul.f32 %v1973_v10, %v1926_v6  ;;  %v2008_v27 = vmul.f32 %v1976_v21, %v1821_v20  ;;  %v2149_v10 = vadd.f32 1.0, %v2866_v28  ;;  %v1990_v21 = vld [vmem:[#allocation4 + $0xb8] sm:$0xff]  ;;  %v1991_v20 = vld [vmem:[#allocation4 + $0xc0] sm:$0xff] }
 0x3bb   : > { %v1928_v32 = vpop.f32.mrf.mxu1  ;;  %v1825_v51 = vpop.f32.mrf.mxu0 }
 0x3bc   : > { %v2006_v0 = vmul.f32 %v1974_v19, %v1928_v32  ;;  %v3975_v17 = vadd.f32 %v2032_v52, %v2031_v35  ;;  %v2033_v5 = vadd.f32 %v2005_v25, %v2003_v42  ;;  %v2011_v46 = vmul.f32 %v1979_v54, %v1825_v51  ;;  %v1986_v35 = vld [vmem:[#allocation4 + $0x98] sm:$0xff]  ;;  %v1989_v32 = vld [vmem:[#allocation4 + $0xb0] sm:$0xff]  ;;  %v1992_v51 = vld [vmem:[#allocation4 + $0xc8] sm:$0xff] }
 0x3bd   : > { %v1932_v1 = vpop.f32.mrf.mxu1  ;;  %v1827_v7 = vpop.f32.mrf.mxu0  ;;  %2871 = vrcp.f32 %v2149_v10  ;;  %v1998_v10 = vld [vmem:[#allocation4 + $0xf8] sm:$0xff] }
 0x3be   : > { %v2034_v31 = vadd.f32 %v2006_v0, %v2004_v62  ;;  %v2009_v36 = vmul.f32 %v1977_v59, %v1932_v1  ;;  %2063 = vrot.lane.b32.xlu0 %v3975_v17, %s2924_s25  ;;  %v2012_v11 = vmul.f32 %v1980_v9, %v1827_v7  ;;  %v1988_v1 = vld [vmem:[#allocation4 + $0xa8] sm:$0xff]  ;;  %2873 = vrcp.f32 %v2147_v40 }
 0x3bf   : > { %v1934_v48 = vpop.f32.mrf.mxu1  ;;  %v1831_v13 = vpop.f32.mrf.mxu0 }
 0x3c0   : > { %v2010_v39 = vmul.f32 %v1978_v18, %v1934_v48  ;;  %v3979_v53 = vadd.f32 %v2034_v31, %v2033_v5  ;;  %v2035_v44 = vadd.f32 %v2009_v36, %v2007_v29  ;;  %v2015_v19 = vmul.f32 %v1983_v41, %v1831_v13  ;;  %v1993_v48 = vld [vmem:[#allocation4 + $0xd0] sm:$0xff]  ;;  %v2870_v13 = vpop.eup %2869 }
 0x3c1   : > { %v1938_v26 = vpop.f32.mrf.mxu1  ;;  %v1833_v42 = vpop.f32.mrf.mxu0 }
 0x3c2   : > { %v2036_v33 = vadd.f32 %v2010_v39, %v2008_v27  ;;  %v2013_v24 = vmul.f32 %v1981_v37, %v1938_v26  ;;  %2065 = vrot.lane.b32.xlu0 %v3979_v53, %s2924_s25  ;;  %v2016_v38 = vmul.f32 %v1984_v2, %v1833_v42  ;;  %v1994_v26 = vld [vmem:[#allocation4 + $0xd8] sm:$0xff] }
 0x3c3   : > { %v1940_v45 = vpop.f32.mrf.mxu1  ;;  %v1837_v0 = vpop.f32.mrf.mxu0 }
 0x3c4   : > { %v2014_v61 = vmul.f32 %v1982_v55, %v1940_v45  ;;  %v3983_v50 = vadd.f32 %v2036_v33, %v2035_v44  ;;  %v2037_v6 = vadd.f32 %v2013_v24, %v2011_v46  ;;  %v2019_v5 = vmul.f32 %v1987_v16, %v1837_v0  ;;  %v1995_v46 = vld [vmem:[#allocation4 + $0xe0] sm:$0xff]  ;;  %v1997_v24 = vld [vmem:[#allocation4 + $0xf0] sm:$0xff] }
 0x3c5   : > { %v1944_v15 = vpop.f32.mrf.mxu1  ;;  %v1839_v29 = vpop.f32.mrf.mxu0 }
 0x3c6   : > { %v2038_v47 = vadd.f32 %v2014_v61, %v2012_v11  ;;  %v2017_v52 = vmul.f32 %v1985_v57, %v1944_v15  ;;  %2067 = vrot.lane.b32.xlu1 %v3983_v50, %s2924_s25  ;;  %v2020_v54 = vmul.f32 %v1988_v1, %v1839_v29  ;;  %v1996_v61 = vld [vmem:[#allocation4 + $0xe8] sm:$0xff] }
 0x3c7   : > { %v1946_v25 = vpop.f32.mrf.mxu1  ;;  %v1843_v39 = vpop.f32.mrf.mxu0 }
 0x3c8   : > { %v2018_v59 = vmul.f32 %v1986_v35, %v1946_v25  ;;  %v3987_v62 = vadd.f32 %v2038_v47, %v2037_v6  ;;  %v2039_v18 = vadd.f32 %v2017_v52, %v2015_v19  ;;  %v2023_v3 = vmul.f32 %v1991_v20, %v1843_v39 }
 0x3c9   : > { %v1950_v30 = vpop.f32.mrf.mxu1  ;;  %v1845_v44 = vpop.f32.mrf.mxu0 }
 0x3ca   : > { %v2040_v22 = vadd.f32 %v2018_v59, %v2016_v38  ;;  %v2021_v31 = vmul.f32 %v1989_v32, %v1950_v30  ;;  %2069 = vrot.lane.b32.xlu0 %v3987_v62, %s2924_s25  ;;  %v2024_v7 = vmul.f32 %v1992_v51, %v1845_v44  ;;  %v2872_v25 = vpop.eup %2871  ;;  %v2172_v59 = vmul.f32 %v2870_v13, %v4149_v34  ;;  %v2506_v34 = vld [vmem:[%s4059_s8] ss:$0 sm:$0xff] }
 0x3cb   : > { %v1952_v36 = vpop.f32.mrf.mxu1  ;;  %v1849_v57 = vpop.f32.mrf.mxu0  ;;  %v2173_v30 = vmul.f32 %v2872_v25, %v4150_v12 }
 0x3cc   : > { %v2022_v37 = vmul.f32 %v1990_v21, %v1952_v36  ;;  %v3991_v27 = vadd.f32 %v2040_v22, %v2039_v18  ;;  %v2041_v9 = vadd.f32 %v2021_v31, %v2019_v5  ;;  %v2027_v35 = vmul.f32 %v1995_v46, %v1849_v57  ;;  %v2874_v16 = vpop.eup %2873  ;;  %v2187_v21 = vpop.permute.xlu0 %2186 }
 0x3cd   : > { %v1956_v28 = vpop.f32.mrf.mxu1  ;;  %v1851_v6 = vpop.f32.mrf.mxu0  ;;  %v2171_v1 = vmul.f32 %v2874_v16, %v4151_v8  ;;  %v2102_v31 = vmul.f32 %v2506_v34, %v4136_v43  ;;  %v2103_v8 = vmul.f32 %v2506_v34, %v4137_v60 }
 0x3ce   : > { %v2042_v55 = vadd.f32 %v2022_v37, %v2020_v54  ;;  %v2025_v49 = vmul.f32 %v1993_v48, %v1956_v28  ;;  %2071 = vrot.lane.b32.xlu0 %v3991_v27, %s2924_s25  ;;  %v2028_v19 = vmul.f32 %v1996_v61, %v1851_v6  ;;  %v2183_v18 = vpop.permute.xlu1 %2182  ;;  %v2104_v28 = vmul.f32 %v2506_v34, %v4138_v56 }
 0x3cf   : > { %v1958_v33 = vpop.f32.mrf.mxu1 }
 0x3d0   : > { %v2026_v45 = vmul.f32 %v1994_v26, %v1958_v33  ;;  %v3995_v41 = vadd.f32 %v2042_v55, %v2041_v9  ;;  %v2043_v15 = vadd.f32 %v2025_v49, %v2023_v3  ;;  %v2191_v22 = vpop.permute.xlu0 %2190  ;;  %v2106_v49 = vmul.f32 %v2506_v34, %v4140_v23 }
 0x3d1   : > { %v1962_v11 = vpop.f32.mrf.mxu1  ;;  %v2109_v23 = vmul.f32 %v2506_v34, %v4143_v58 }
 0x3d2   : > { %v2044_v2 = vadd.f32 %v2026_v45, %v2024_v7  ;;  %v2029_v40 = vmul.f32 %v1997_v24, %v1962_v11  ;;  %2073 = vrot.lane.b32.xlu1 %v3995_v41, %s2924_s25  ;;  %v2185_v5 = vpop.permute.xlu1 %2184 }
 0x3d3   : > { %v1964_v47 = vpop.f32.mrf.mxu1 }
 0x3d4   : > { %v2030_v52 = vmul.f32 %v1998_v10, %v1964_v47  ;;  %v2053_v42 = vadd.f32 %v2044_v2, %v2043_v15  ;;  %v2045_v32 = vadd.f32 %v2029_v40, %v2027_v35 }
 0x3d6   : > { %v2046_v38 = vadd.f32 %v2030_v52, %v2028_v19  ;;  %2075 = vrot.lane.b32.xlu1 %v2053_v42, %s2924_s25  ;;  %v2189_v12 = vpop.permute.xlu1 %2188 }
 0x3d8   : > { %v2054_v0 = vadd.f32 %v2046_v38, %v2045_v32 }
 0x3da   : > { %2194 = vrot.lane.b32.xlu1 %v2172_v59, %s2924_s25  ;;  %2077 = vrot.lane.b32.xlu0 %v2054_v0, %s2924_s25 }
 0x3de   : > { %2196 = vrot.lane.b32.xlu1 %v2173_v30, %s2924_s25  ;;  %2192 = vrot.lane.b32.xlu0 %v2171_v1, %s2924_s25 }
 0x430   : > { %v2064_v29 = vpop.permute.xlu0 %2063 }
 0x431   : > { %v2087_v36 = vadd.f32 %v2064_v29, %v3975_v17  ;;  %v2105_v17 = vmul.f32 %v2506_v34, %v4139_v14  ;;  %v2108_v14 = vmul.f32 %v2506_v34, %v4142_v63 }
 0x433   : > { %v2110_v20 = vadd.f32 %v2102_v31, %v2087_v36 }
 0x434   : > { %v2066_v48 = vpop.permute.xlu0 %2065 }
 0x435   : > { %v2088_v54 = vadd.f32 %v2066_v48, %v3979_v53  ;;  %v2206_v37 = vmul.f32 %v2183_v18, %v2110_v20 }
 0x437   : > { %v2111_v39 = vadd.f32 %v2103_v8, %v2088_v54  ;;  %2637 = vmatprep.mubr.msk.f32.mxu0 %vm502_vm1, %v2206_v37 }
 0x438   : > { %v2068_v51 = vpop.permute.xlu1 %2067 }
 0x439   : > { %v2207_v26 = vmul.f32 %v2185_v5, %v2111_v39  ;;  %v2089_v43 = vadd.f32 %v2068_v51, %v3983_v50 }
 0x43b   : > { %v2112_v9 = vadd.f32 %v2104_v28, %v2089_v43  ;;  %2638 = vmatmul.mubr.msk.f32.vlgmr.msra.gmra.mxu0 %vm502_vm1, %v2207_v26 }
 0x43c   : > { %v2070_v55 = vpop.permute.xlu0 %2069 }
 0x43d   : > { %v2090_v60 = vadd.f32 %v2070_v55, %v3987_v62  ;;  %v2208_v3 = vmul.f32 %v2187_v21, %v2112_v9 }
 0x43f   : > { %v2113_v53 = vadd.f32 %v2105_v17, %v2090_v60  ;;  %2640 = vmatprep.mubr.msk.f32.mxu0 %vm502_vm1, %v2208_v3 }
 0x440   : > { %v2072_v44 = vpop.permute.xlu0 %2071 }
 0x441   : > { %v2091_v56 = vadd.f32 %v2072_v44, %v3991_v27  ;;  %v2209_v33 = vmul.f32 %v2189_v12, %v2113_v53  ;;  %v2107_v27 = vmul.f32 %v2506_v34, %v4141_v4 }
 0x443   : > { %v2114_v46 = vadd.f32 %v2106_v49, %v2091_v56  ;;  %2641 = vmatmul.mubr.msk.f32.gmra.mxu0 %vm502_vm1, %v2209_v33 }
 0x444   : > { %v2074_v50 = vpop.permute.xlu1 %2073 }
 0x445   : > { %v2210_v24 = vmul.f32 %v2191_v22, %v2114_v46  ;;  %v2092_v45 = vadd.f32 %v2074_v50, %v3995_v41 }
 0x447   : > { %2643 = vmatprep.mubr.msk.f32.mxu0 %vm502_vm1, %v2210_v24  ;;  %v2115_v15 = vadd.f32 %v2107_v27, %v2092_v45 }
 0x448   : > { %v2076_v62 = vpop.permute.xlu1 %2075 }
 0x449   : > { %v2093_v7 = vadd.f32 %v2076_v62, %v2053_v42 }
 0x44b   : > { %v2116_v57 = vadd.f32 %v2108_v14, %v2093_v7 }
 0x44c   : > { %v2195_v11 = vpop.permute.xlu1 %2194  ;;  %v2078_v61 = vpop.permute.xlu0 %2077 }
 0x44d   : > { %v2212_v10 = vmul.f32 %v2195_v11, %v2116_v57  ;;  %v2094_v13 = vadd.f32 %v2078_v61, %v2054_v0 }
 0x44f   : > { %2646 = vmatprep.mubr.msk.f32.mxu1 %vm502_vm1, %v2212_v10  ;;  %v2117_v63 = vadd.f32 %v2109_v23, %v2094_v13 }
 0x450   : > { %v2197_v2 = vpop.permute.xlu1 %2196  ;;  %v2193_v41 = vpop.permute.xlu0 %2192 }
 0x451   : > { %v2213_v35 = vmul.f32 %v2197_v2, %v2117_v63  ;;  %v2211_v58 = vmul.f32 %v2193_v41, %v2115_v15 }
 0x453   : > { %2644 = vmatmul.mubr.msk.f32.gmra.mxu0 %vm502_vm1, %v2211_v58  ;;  %2647 = vmatmul.mubr.msk.f32.vlgmr.msra.gmra.mxu1 %vm502_vm1, %v2213_v35 }
 0x4fb   : > { %v2639_v4 = vpop.f32.mrf.mxu0 }
 0x4fc   : > { %2352 = vst.msk [vmem:[%s3006_s29 + $0x8] sm:$0xff] %vm372_vm0, %v2639_v4 }
 0x4fd   : > { %v2312_v40 = vpop.f32.mrf.mxu0 }
 0x4fe   : > { %2351 = vst.msk [vmem:[%s3006_s29] sm:$0xff] %vm372_vm0, %v2312_v40 }
 0x503   : > { %v2642_v6 = vpop.f32.mrf.mxu0 }
 0x504   : > { %2354 = vst.msk [vmem:[%s3006_s29 + $0x18] sm:$0xff] %vm372_vm0, %v2642_v6 }
 0x505   : > { %v2322_v47 = vpop.f32.mrf.mxu0 }
 0x506   : > { %2353 = vst.msk [vmem:[%s3006_s29 + $0x10] sm:$0xff] %vm372_vm0, %v2322_v47 }
 0x513   : > { %v2645_v19 = vpop.f32.mrf.mxu0  ;;  %v2648_v52 = vpop.f32.mrf.mxu1 }
 0x514   : > { %2356 = vst.msk [vmem:[%s3006_s29 + $0x28] sm:$0xff] %vm372_vm0, %v2645_v19  ;;  %2358 = vst.msk [vmem:[%s3006_s29 + $0x38] sm:$0xff] %vm372_vm0, %v2648_v52 }
 0x515   : > { %v2332_v42 = vpop.f32.mrf.mxu0  ;;  %v2342_v25 = vpop.f32.mrf.mxu1 }
 0x516   : > { %2355 = vst.msk [vmem:[%s3006_s29 + $0x20] sm:$0xff] %vm372_vm0, %v2332_v42  ;;  %2357 = vst.msk [vmem:[%s3006_s29 + $0x30] sm:$0xff] %vm372_vm0, %v2342_v25 }
 0x517 PF: > { %s20_s13 = sadd.s32 1, %s2901_s13  }
 0x518   : > { %p17_p5 = scmp.ge.s32.totalorder %s20_s13, 4  }
 0x51a   :  { %19 = sbr.rel (!%p17_p5) target bundleno = 1 (0x1), region = 110 }

</bundles_post_ra>
